<compile_context>
chip_gen: v7x
topology: tpu7x:2x2x1
jax: 0.10.0
libtpu: 0.0.40
codegen_flags: <defaults>
</compile_context>

<pallas_src>
import functools

import jax
import jax.numpy as jnp
import numpy as np
from jax.experimental import pallas as pl
from jax.experimental.pallas import tpu as pltpu


def _block_kernel(xfe_ref, w1_ref, b1_ref, w2_ref, b2_ref, mask_ref,
                  o_ref, mid_ref, *, k, Wp, HpWp, ext):
    # xfe_ref : (Cin,  E)           halo-extended, flattened, zero-padded input frame
    # w1_ref  : (Cmid, k*k*Cin)     conv1 weights, tap-major / channel-minor
    # b1_ref  : (Cmid, 1)           f32
    # w2_ref  : (Cout, k*k*Cmid)    conv2 weights (res_scale folded in)
    # b2_ref  : (Cout, 1)           f32 (res_scale folded in)
    # mask_ref: (1, HpWp)           1.0 at interior (valid) pixels, 0.0 on frame border
    # o_ref   : (Cout, HpWp)        output over the padded frame (border is garbage,
    #                               sliced away in the wrapper)
    # mid_ref : VMEM (Cmid, E)      halo-extended conv1 activation (scratch)
    cmid = w1_ref.shape[0]

    # ---- conv1: one fused im2col matmul (K = k*k*Cin) -----------------------
    taps1 = [xfe_ref[:, dy * Wp + dx: dy * Wp + dx + HpWp]
             for dy in range(k) for dx in range(k)]
    patch1 = jnp.concatenate(taps1, axis=0)                    # (k*k*Cin, HpWp)
    acc1 = jnp.dot(w1_ref[...], patch1,
                   preferred_element_type=jnp.float32)         # (Cmid, HpWp) f32
    # bias + ReLU, then zero the frame-border garbage so it acts as conv2's
    # "same" zero padding.
    acc1 = jnp.maximum(acc1 + b1_ref[...], 0.0) * mask_ref[...]

    # ---- stage conv1 output in the halo-extended scratch --------------------
    # Only the two `ext`-wide halo strips need zeroing; the interior is fully
    # overwritten every grid step (no full-scratch clear, no full reload).
    mid_ref[:, :ext] = jnp.zeros((cmid, ext), mid_ref.dtype)
    mid_ref[:, ext + HpWp:] = jnp.zeros((cmid, ext), mid_ref.dtype)
    mid_ref[:, ext:ext + HpWp] = acc1.astype(mid_ref.dtype)

    # ---- conv2: one fused im2col matmul (K = k*k*Cmid) ----------------------
    taps2 = [mid_ref[:, dy * Wp + dx: dy * Wp + dx + HpWp]
             for dy in range(k) for dx in range(k)]
    patch2 = jnp.concatenate(taps2, axis=0)                    # (k*k*Cmid, HpWp)
    acc2 = jnp.dot(w2_ref[...], patch2,
                   preferred_element_type=jnp.float32)         # (Cout, HpWp) f32

    # ---- bias (+res_scale already folded) + residual add --------------------
    x_center = xfe_ref[:, ext:ext + HpWp].astype(jnp.float32)  # == padded x frame
    out = acc2 + b2_ref[...] + x_center
    o_ref[...] = out.astype(o_ref.dtype)


def wdsr_block(x_nchw, w1_oihw, b1, w2_oihw, b2, *, res_scale=1.0,
               compute_dtype=jnp.float32):
    """x: (B, Cin, H, W); w1: (Cmid, Cin, k, k); w2: (Cout, Cmid, k, k) (OIHW)."""
    B, Cin, H, W = x_nchw.shape
    Cmid, _, k, _ = w1_oihw.shape
    Cout = w2_oihw.shape[0]
    assert Cout == Cin, "residual add requires Cout == Cin"
    p = k // 2
    Hp, Wp = H + 2 * p, W + 2 * p
    HpWp = Hp * Wp
    ext = p * Wp + p                 # halo so every tap slice stays in-bounds
    E = HpWp + 2 * ext

    cdt = compute_dtype

    # ---- wrapper-side layout plumbing (pure XLA) ----------------------------
    # input: zero-pad spatially, flatten (Hp,Wp) onto lanes, add `ext` halo zeros
    x_pad = jnp.pad(x_nchw, ((0, 0), (0, 0), (p, p), (p, p)))          # (B,C,Hp,Wp)
    xfe = jnp.pad(x_pad.reshape(B, Cin, HpWp), ((0, 0), (0, 0), (ext, ext)))
    xfe = xfe.astype(cdt)                                              # (B,C,E)

    # weights: OIHW -> (O, k*k*I), tap-major / channel-minor (matches patch order)
    w1t = jnp.transpose(w1_oihw, (0, 2, 3, 1)).reshape(Cmid, k * k * Cin)
    w2t = jnp.transpose(w2_oihw, (0, 2, 3, 1)).reshape(Cout, k * k * Cmid)
    w1t = w1t.astype(cdt)
    w2t = (w2t * res_scale).astype(cdt)          # fold res_scale into conv2
    b1c = b1.reshape(Cmid, 1).astype(jnp.float32)
    b2c = (b2 * res_scale).reshape(Cout, 1).astype(jnp.float32)

    # interior mask over the flattened padded frame (zeroes conv1 border garbage)
    idx = jnp.arange(HpWp)
    rows, cols = idx // Wp, idx % Wp
    interior = (rows >= p) & (rows < p + H) & (cols >= p) & (cols < p + W)
    mask = interior.astype(jnp.float32).reshape(1, HpWp)

    kernel = functools.partial(_block_kernel, k=k, Wp=Wp, HpWp=HpWp, ext=ext)

    out_flat = pl.pallas_call(
        kernel,
        out_shape=jax.ShapeDtypeStruct((B, Cout, HpWp), x_nchw.dtype),
        grid=(B,),
        in_specs=[
            pl.BlockSpec((None, Cin, E), lambda b: (b, 0, 0)),
            pl.BlockSpec((Cmid, k * k * Cin), lambda b: (0, 0)),
            pl.BlockSpec((Cmid, 1), lambda b: (0, 0)),
            pl.BlockSpec((Cout, k * k * Cmid), lambda b: (0, 0)),
            pl.BlockSpec((Cout, 1), lambda b: (0, 0)),
            pl.BlockSpec((1, HpWp), lambda b: (0, 0)),
        ],
        out_specs=pl.BlockSpec((None, Cout, HpWp), lambda b: (b, 0, 0)),
        scratch_shapes=[pltpu.VMEM((Cmid, E), cdt)],
        compiler_params=pltpu.CompilerParams(
            dimension_semantics=("parallel",)),
    )(xfe, w1t, b1c, w2t, b2c, mask)

    # drop the padded border and restore NCHW spatial shape (layout plumbing)
    out = out_flat.reshape(B, Cout, Hp, Wp)[:, :, p:p + H, p:p + W]
    return out


def _init_wn_conv(key, out_ch, in_ch, k):
    """nn.Conv2d-style init + torch weight_norm reparameterization (OIHW)."""
    kv, kb = jax.random.split(key)
    fan_in = in_ch * k * k
    bound = 1.0 / np.sqrt(fan_in)
    v = jax.random.uniform(kv, (out_ch, in_ch, k, k), jnp.float32, -bound, bound)
    g = jnp.sqrt(jnp.sum(v * v, axis=(1, 2, 3)))                       # (out_ch,)
    norm = jnp.sqrt(jnp.sum(v * v, axis=(1, 2, 3), keepdims=True))
    w_oihw = g[:, None, None, None] * v / norm                         # effective w
    b = jax.random.uniform(kb, (out_ch,), jnp.float32, -bound, bound)
    return w_oihw, b


def _reference(x_nchw, w1_oihw, b1, w2_oihw, b2, res_scale):
    """Pure-JAX reference (lax conv) for validation."""
    x = jnp.transpose(x_nchw, (0, 2, 3, 1))
    w1 = jnp.transpose(w1_oihw, (2, 3, 1, 0))
    w2 = jnp.transpose(w2_oihw, (2, 3, 1, 0))
    dn1 = jax.lax.conv_dimension_numbers(x.shape, w1.shape, ("NHWC", "HWIO", "NHWC"))
    y = jax.lax.conv_general_dilated(x, w1, (1, 1), "SAME", dimension_numbers=dn1)
    y = jnp.maximum(y + b1[None, None, None, :], 0.0)
    dn2 = jax.lax.conv_dimension_numbers(y.shape, w2.shape, ("NHWC", "HWIO", "NHWC"))
    z = jax.lax.conv_general_dilated(y, w2, (1, 1), "SAME", dimension_numbers=dn2)
    z = z + b2[None, None, None, :]
    out = z * res_scale + x
    return jnp.transpose(out, (0, 3, 1, 2))


if __name__ == "__main__":
    # Block(n_feats=4, kernel_size=3, block_feats=32, wn=weight_norm, res_scale=1.0)
    B, n_feats, H, W = 2, 4, 16, 16
    block_feats, ksz = 32, 3
    res_scale = 1.0

    key = jax.random.PRNGKey(0)
    kx, k1, k2 = jax.random.split(key, 3)

    x = jax.random.normal(kx, (B, n_feats, H, W), jnp.float32)
    w1, b1 = _init_wn_conv(k1, block_feats, n_feats, ksz)
    w2, b2 = _init_wn_conv(k2, n_feats, block_feats, ksz)

    ref = _reference(x, w1, b1, w2, b2, res_scale)

    # f32 compute path: tight correctness gate.
    out = wdsr_block(x, w1, b1, w2, b2, res_scale=res_scale,
                     compute_dtype=jnp.float32)
    out = jax.block_until_ready(out)
    assert out.shape == (B, n_feats, H, W)
    np.testing.assert_allclose(np.asarray(out), np.asarray(ref),
                               rtol=1e-4, atol=1e-4)

    # bf16 compute path (v6e/v7x MXU-native, f32 accumulation): loose sanity gate.
    out_bf16 = wdsr_block(x, w1, b1, w2, b2, res_scale=res_scale,
                          compute_dtype=jnp.bfloat16)
    out_bf16 = jax.block_until_ready(out_bf16)
    np.testing.assert_allclose(np.asarray(out_bf16), np.asarray(ref),
                               rtol=1e-1, atol=1e-1)

    print("KERNEL_OK")
</pallas_src>

<mosaic_0001>
module attributes {stable_mosaic.version = 11 : i64} {
  func.func @_block_kernel(%arg0: i32, %arg1: memref<1x4x362xf32, #tpu.memory_space<vmem>>, %arg2: memref<32x36xf32, #tpu.memory_space<vmem>>, %arg3: memref<32x1xf32, #tpu.memory_space<vmem>>, %arg4: memref<4x288xf32, #tpu.memory_space<vmem>>, %arg5: memref<4x1xf32, #tpu.memory_space<vmem>>, %arg6: memref<1x324xf32, #tpu.memory_space<vmem>>, %arg7: memref<1x4x324xf32, #tpu.memory_space<vmem>>, %arg8: memref<32x362xf32, #tpu.memory_space<vmem>>) attributes {dimension_semantics = [#tpu.dimension_semantics<parallel>], iteration_bounds = array<i64: 2>, scalar_prefetch = 0 : i64, scratch_operands = 1 : i64, tpu.core_type = #tpu.core_type<tc>, window_params = [{transform_indices = @transform_0, window_bounds = array<i64: 1, 4, 362>}, {pipeline_mode = #tpu.pipeline_mode<synchronous>, transform_indices = @transform_1, window_bounds = array<i64: 32, 36>}, {pipeline_mode = #tpu.pipeline_mode<synchronous>, transform_indices = @transform_2, window_bounds = array<i64: 32, 1>}, {pipeline_mode = #tpu.pipeline_mode<synchronous>, transform_indices = @transform_3, window_bounds = array<i64: 4, 288>}, {pipeline_mode = #tpu.pipeline_mode<synchronous>, transform_indices = @transform_4, window_bounds = array<i64: 4, 1>}, {pipeline_mode = #tpu.pipeline_mode<synchronous>, transform_indices = @transform_5, window_bounds = array<i64: 1, 324>}, {transform_indices = @transform_6, window_bounds = array<i64: 1, 4, 324>}]} {
    %c0 = arith.constant 0 : index
    %c0_0 = arith.constant 0 : index
    %c0_1 = arith.constant 0 : index
    %0 = vector.load %arg1[%c0, %c0_0, %c0_1] : memref<1x4x362xf32, #tpu.memory_space<vmem>>, vector<1x4x324xf32>
    %1 = vector.shape_cast %0 : vector<1x4x324xf32> to vector<4x324xf32>
    %c0_2 = arith.constant 0 : index
    %c0_3 = arith.constant 0 : index
    %c1 = arith.constant 1 : index
    %2 = vector.load %arg1[%c0_2, %c0_3, %c1] : memref<1x4x362xf32, #tpu.memory_space<vmem>>, vector<1x4x324xf32>
    %3 = vector.shape_cast %2 : vector<1x4x324xf32> to vector<4x324xf32>
    %c0_4 = arith.constant 0 : index
    %c0_5 = arith.constant 0 : index
    %c2 = arith.constant 2 : index
    %4 = vector.load %arg1[%c0_4, %c0_5, %c2] : memref<1x4x362xf32, #tpu.memory_space<vmem>>, vector<1x4x324xf32>
    %5 = vector.shape_cast %4 : vector<1x4x324xf32> to vector<4x324xf32>
    %c0_6 = arith.constant 0 : index
    %c0_7 = arith.constant 0 : index
    %c18 = arith.constant 18 : index
    %6 = vector.load %arg1[%c0_6, %c0_7, %c18] : memref<1x4x362xf32, #tpu.memory_space<vmem>>, vector<1x4x324xf32>
    %7 = vector.shape_cast %6 : vector<1x4x324xf32> to vector<4x324xf32>
    %c0_8 = arith.constant 0 : index
    %c0_9 = arith.constant 0 : index
    %c19 = arith.constant 19 : index
    %8 = vector.load %arg1[%c0_8, %c0_9, %c19] : memref<1x4x362xf32, #tpu.memory_space<vmem>>, vector<1x4x324xf32>
    %9 = vector.shape_cast %8 : vector<1x4x324xf32> to vector<4x324xf32>
    %c0_10 = arith.constant 0 : index
    %c0_11 = arith.constant 0 : index
    %c20 = arith.constant 20 : index
    %10 = vector.load %arg1[%c0_10, %c0_11, %c20] : memref<1x4x362xf32, #tpu.memory_space<vmem>>, vector<1x4x324xf32>
    %11 = vector.shape_cast %10 : vector<1x4x324xf32> to vector<4x324xf32>
    %c0_12 = arith.constant 0 : index
    %c0_13 = arith.constant 0 : index
    %c36 = arith.constant 36 : index
    %12 = vector.load %arg1[%c0_12, %c0_13, %c36] : memref<1x4x362xf32, #tpu.memory_space<vmem>>, vector<1x4x324xf32>
    %13 = vector.shape_cast %12 : vector<1x4x324xf32> to vector<4x324xf32>
    %c0_14 = arith.constant 0 : index
    %c0_15 = arith.constant 0 : index
    %c37 = arith.constant 37 : index
    %14 = vector.load %arg1[%c0_14, %c0_15, %c37] : memref<1x4x362xf32, #tpu.memory_space<vmem>>, vector<1x4x324xf32>
    %15 = vector.shape_cast %14 : vector<1x4x324xf32> to vector<4x324xf32>
    %c0_16 = arith.constant 0 : index
    %c0_17 = arith.constant 0 : index
    %c38 = arith.constant 38 : index
    %16 = vector.load %arg1[%c0_16, %c0_17, %c38] : memref<1x4x362xf32, #tpu.memory_space<vmem>>, vector<1x4x324xf32>
    %17 = vector.shape_cast %16 : vector<1x4x324xf32> to vector<4x324xf32>
    %18 = tpu.concatenate %1, %3, %5, %7, %9, %11, %13, %15, %17 in 0 : vector<4x324xf32>, vector<4x324xf32>, vector<4x324xf32>, vector<4x324xf32>, vector<4x324xf32>, vector<4x324xf32>, vector<4x324xf32>, vector<4x324xf32>, vector<4x324xf32> -> vector<36x324xf32>
    %c0_18 = arith.constant 0 : index
    %c0_19 = arith.constant 0 : index
    %19 = vector.load %arg2[%c0_18, %c0_19] : memref<32x36xf32, #tpu.memory_space<vmem>>, vector<32x36xf32>
    %cst = arith.constant dense<0.000000e+00> : vector<32x324xf32>
    %20 = tpu.matmul %19, %18, %cst {dimension_numbers = #tpu.dot_dimension_numbers<[1], [0], [0], [1], [0, 0, 1, 1], [], []>} : vector<32x36xf32>, vector<36x324xf32>, vector<32x324xf32> -> vector<32x324xf32>
    %c0_20 = arith.constant 0 : index
    %c0_21 = arith.constant 0 : index
    %21 = vector.load %arg3[%c0_20, %c0_21] : memref<32x1xf32, #tpu.memory_space<vmem>>, vector<32x1xf32>
    %22 = vector.broadcast %21 : vector<32x1xf32> to vector<32x324xf32>
    %23 = arith.addf %20, %22 : vector<32x324xf32>
    %cst_22 = arith.constant 0.000000e+00 : f32
    %24 = vector.broadcast %cst_22 : f32 to vector<32x324xf32>
    %25 = arith.maximumf %23, %24 : vector<32x324xf32>
    %c0_23 = arith.constant 0 : index
    %c0_24 = arith.constant 0 : index
    %26 = vector.load %arg6[%c0_23, %c0_24] : memref<1x324xf32, #tpu.memory_space<vmem>>, vector<1x324xf32>
    %27 = vector.broadcast %26 : vector<1x324xf32> to vector<32x324xf32>
    %28 = arith.mulf %25, %27 : vector<32x324xf32>
    %cst_25 = arith.constant 0.000000e+00 : f32
    %29 = vector.broadcast %cst_25 : f32 to vector<32x19xf32>
    %c0_26 = arith.constant 0 : index
    %c0_27 = arith.constant 0 : index
    %30 = vector.load %arg8[%c0_26, %c0_27] : memref<32x362xf32, #tpu.memory_space<vmem>>, vector<32x19xf32>
    tpu.vector_store %arg8[%c0_26, %c0_27], %29 {strides = array<i32>} : memref<32x362xf32, #tpu.memory_space<vmem>>, vector<32x19xf32>,
    %cst_28 = arith.constant 0.000000e+00 : f32
    %31 = vector.broadcast %cst_28 : f32 to vector<32x19xf32>
    %c0_29 = arith.constant 0 : index
    %c343 = arith.constant 343 : index
    %32 = vector.load %arg8[%c0_29, %c343] : memref<32x362xf32, #tpu.memory_space<vmem>>, vector<32x19xf32>
    tpu.vector_store %arg8[%c0_29, %c343], %31 {strides = array<i32>} : memref<32x362xf32, #tpu.memory_space<vmem>>, vector<32x19xf32>,
    %c0_30 = arith.constant 0 : index
    %c19_31 = arith.constant 19 : index
    %33 = vector.load %arg8[%c0_30, %c19_31] : memref<32x362xf32, #tpu.memory_space<vmem>>, vector<32x324xf32>
    tpu.vector_store %arg8[%c0_30, %c19_31], %28 {strides = array<i32>} : memref<32x362xf32, #tpu.memory_space<vmem>>, vector<32x324xf32>,
    %c0_32 = arith.constant 0 : index
    %c0_33 = arith.constant 0 : index
    %34 = vector.load %arg8[%c0_32, %c0_33] : memref<32x362xf32, #tpu.memory_space<vmem>>, vector<32x324xf32>
    %c0_34 = arith.constant 0 : index
    %c1_35 = arith.constant 1 : index
    %35 = vector.load %arg8[%c0_34, %c1_35] : memref<32x362xf32, #tpu.memory_space<vmem>>, vector<32x324xf32>
    %c0_36 = arith.constant 0 : index
    %c2_37 = arith.constant 2 : index
    %36 = vector.load %arg8[%c0_36, %c2_37] : memref<32x362xf32, #tpu.memory_space<vmem>>, vector<32x324xf32>
    %c0_38 = arith.constant 0 : index
    %c18_39 = arith.constant 18 : index
    %37 = vector.load %arg8[%c0_38, %c18_39] : memref<32x362xf32, #tpu.memory_space<vmem>>, vector<32x324xf32>
    %c0_40 = arith.constant 0 : index
    %c19_41 = arith.constant 19 : index
    %38 = vector.load %arg8[%c0_40, %c19_41] : memref<32x362xf32, #tpu.memory_space<vmem>>, vector<32x324xf32>
    %c0_42 = arith.constant 0 : index
    %c20_43 = arith.constant 20 : index
    %39 = vector.load %arg8[%c0_42, %c20_43] : memref<32x362xf32, #tpu.memory_space<vmem>>, vector<32x324xf32>
    %c0_44 = arith.constant 0 : index
    %c36_45 = arith.constant 36 : index
    %40 = vector.load %arg8[%c0_44, %c36_45] : memref<32x362xf32, #tpu.memory_space<vmem>>, vector<32x324xf32>
    %c0_46 = arith.constant 0 : index
    %c37_47 = arith.constant 37 : index
    %41 = vector.load %arg8[%c0_46, %c37_47] : memref<32x362xf32, #tpu.memory_space<vmem>>, vector<32x324xf32>
    %c0_48 = arith.constant 0 : index
    %c38_49 = arith.constant 38 : index
    %42 = vector.load %arg8[%c0_48, %c38_49] : memref<32x362xf32, #tpu.memory_space<vmem>>, vector<32x324xf32>
    %43 = tpu.concatenate %34, %35, %36, %37, %38, %39, %40, %41, %42 in 0 : vector<32x324xf32>, vector<32x324xf32>, vector<32x324xf32>, vector<32x324xf32>, vector<32x324xf32>, vector<32x324xf32>, vector<32x324xf32>, vector<32x324xf32>, vector<32x324xf32> -> vector<288x324xf32>
    %c0_50 = arith.constant 0 : index
    %c0_51 = arith.constant 0 : index
    %44 = vector.load %arg4[%c0_50, %c0_51] : memref<4x288xf32, #tpu.memory_space<vmem>>, vector<4x288xf32>
    %cst_52 = arith.constant dense<0.000000e+00> : vector<4x324xf32>
    %45 = tpu.matmul %44, %43, %cst_52 {dimension_numbers = #tpu.dot_dimension_numbers<[1], [0], [0], [1], [0, 0, 1, 1], [], []>} : vector<4x288xf32>, vector<288x324xf32>, vector<4x324xf32> -> vector<4x324xf32>
    %c0_53 = arith.constant 0 : index
    %c0_54 = arith.constant 0 : index
    %c19_55 = arith.constant 19 : index
    %46 = vector.load %arg1[%c0_53, %c0_54, %c19_55] : memref<1x4x362xf32, #tpu.memory_space<vmem>>, vector<1x4x324xf32>
    %47 = vector.shape_cast %46 : vector<1x4x324xf32> to vector<4x324xf32>
    %c0_56 = arith.constant 0 : index
    %c0_57 = arith.constant 0 : index
    %48 = vector.load %arg5[%c0_56, %c0_57] : memref<4x1xf32, #tpu.memory_space<vmem>>, vector<4x1xf32>
    %49 = vector.broadcast %48 : vector<4x1xf32> to vector<4x324xf32>
    %50 = arith.addf %45, %49 : vector<4x324xf32>
    %51 = arith.addf %50, %47 : vector<4x324xf32>
    %c0_58 = arith.constant 0 : index
    %c0_59 = arith.constant 0 : index
    %c0_60 = arith.constant 0 : index
    %52 = vector.load %arg7[%c0_58, %c0_59, %c0_60] : memref<1x4x324xf32, #tpu.memory_space<vmem>>, vector<1x4x324xf32>
    %53 = vector.shape_cast %52 : vector<1x4x324xf32> to vector<4x324xf32>
    %54 = vector.shape_cast %51 : vector<4x324xf32> to vector<1x4x324xf32>
    tpu.vector_store %arg7[%c0_58, %c0_59, %c0_60], %54 {strides = array<i32>} : memref<1x4x324xf32, #tpu.memory_space<vmem>>, vector<1x4x324xf32>,
    return
  }
  func.func @transform_0(%arg0: i32) -> (i32, i32, i32) {
    %c0_i32 = arith.constant 0 : i32
    %c0_i32_0 = arith.constant 0 : i32
    %c0_i32_1 = arith.constant 0 : i32
    return %arg0, %c0_i32, %c0_i32_0 : i32, i32, i32
  }
  func.func @transform_1(%arg0: i32) -> (i32, i32) {
    %c0_i32 = arith.constant 0 : i32
    %c0_i32_0 = arith.constant 0 : i32
    %c0_i32_1 = arith.constant 0 : i32
    return %c0_i32, %c0_i32_0 : i32, i32
  }
  func.func @transform_2(%arg0: i32) -> (i32, i32) {
    %c0_i32 = arith.constant 0 : i32
    %c0_i32_0 = arith.constant 0 : i32
    %c0_i32_1 = arith.constant 0 : i32
    return %c0_i32, %c0_i32_0 : i32, i32
  }
  func.func @transform_3(%arg0: i32) -> (i32, i32) {
    %c0_i32 = arith.constant 0 : i32
    %c0_i32_0 = arith.constant 0 : i32
    %c0_i32_1 = arith.constant 0 : i32
    return %c0_i32, %c0_i32_0 : i32, i32
  }
  func.func @transform_4(%arg0: i32) -> (i32, i32) {
    %c0_i32 = arith.constant 0 : i32
    %c0_i32_0 = arith.constant 0 : i32
    %c0_i32_1 = arith.constant 0 : i32
    return %c0_i32, %c0_i32_0 : i32, i32
  }
  func.func @transform_5(%arg0: i32) -> (i32, i32) {
    %c0_i32 = arith.constant 0 : i32
    %c0_i32_0 = arith.constant 0 : i32
    %c0_i32_1 = arith.constant 0 : i32
    return %c0_i32, %c0_i32_0 : i32, i32
  }
  func.func @transform_6(%arg0: i32) -> (i32, i32, i32) {
    %c0_i32 = arith.constant 0 : i32
    %c0_i32_0 = arith.constant 0 : i32
    %c0_i32_1 = arith.constant 0 : i32
    return %arg0, %c0_i32, %c0_i32_0 : i32, i32, i32
  }
}

</mosaic_0001>

<bundles_post_ra>
// kernel: tpu_custom_call.1
= control target key start
LH: loop header
LB: loop body
LE: loop exit
PB: predicated region body
PF: predicated region fallthrough
CT: control target
= control target key end

     0   :  { %11 = vsyncpa [#allocation4], 0  ;;  %s2926_s0 = inlined_call_operand.hbm [shape: f32[2,4,362], index: 0, kind: input, shape index: {}]   ;;  %s2927_s1 = inlined_call_operand.vmem [shape: f32[32,36], index: 1, kind: input, shape index: {}]   ;;  %s2928_s2 = inlined_call_operand.vmem [shape: f32[32,1], index: 2, kind: input, shape index: {}]   ;;  %s2929_s3 = inlined_call_operand.vmem [shape: f32[4,288], index: 3, kind: input, shape index: {}]   ;;  %s2930_s4 = inlined_call_operand.vmem [shape: f32[4,1], index: 4, kind: input, shape index: {}]   ;;  %s2931_s5 = inlined_call_operand.vmem [shape: f32[1,324], index: 5, kind: input, shape index: {}]   ;;  %s2932_s6 = inlined_call_operand.hbm [shape: f32[2,4,324], index: 6, kind: output, shape index: {}]  }
   0x1   :  { %13 = vsyncpa [#allocation4 + $0x1], 0 }
   0x2   :  { %14 = vsyncpa [#allocation5], 0 }
   0x3   :  { %16 = vsyncpa [#allocation5 + $0x1], 0  ;;  %s2228_s21 = smov 0   ;;  %s2230_s22 = smov 0  }
   0x4   :  { %s2232_s23 = smov 0   ;;  %s2234_s24 = smov 0  }
   0x5 LB: > { %s2249_s25 = sadd.s32 4294967295, %s2176_s24   ;;  %s1508_s26 = sadd.s32 4294967294, %s2176_s24   ;;  %s2176_s24 = sphi %s2234_s24, %s2957_s24   ;;  %s2172_s23 = sphi %s2232_s23, %s2956_s23   ;;  %s2168_s22 = sphi %s2230_s22, %s2955_s22   ;;  %s2164_s21 = sphi %s2228_s21, %s2954_s21  }
   0x6   : > { %s2253_s27 = sadd.s32 1, %s2176_s24   ;;  %s29_s28 = sadd.s32 1, %s2172_s23 }
   0x7   : > { %s26_s29 = ssub.s32 %s2176_s24, %s2253_s27  ;;  %p36_p0 = scmp.ne.s32.totalorder %s2172_s23, %s2168_s22 }
   0x8   : > { %p27_p1 = scmp.eq.s32.totalorder %s26_s29, 0  ;;  %p37_p2 = scmp.eq.s32.totalorder %s2176_s24, 0 }
   0x9   : > { %p42_p3 = scmp.ne.s32.totalorder %s2168_s22, %s2164_s21  ;;  %p43_p4 = scmp.eq.s32.totalorder %s2249_s25, 0 }
   0xa   : > { %s2265_s30 = scalar_select %p27_p1, %s2172_s23, %s29_s28  }
   0xb   : > { %p38_p5 = por %p37_p2, %p36_p0  ;;  %p2267_p6 = por %p43_p4, %p42_p3 }
   0xc   : > { %p171_p7 = scmp.eq.s32.totalorder %s2249_s25, 1  ;;  %p177_p8 = scmp.eq.s32.totalorder %s1508_s26, 1 }
   0xd   : > { %p1751_p10 = scmp.lt.s32.totalorder %s2176_s24, 2  ;;  %s212_s10 = sand.u32 1, %s2172_s23  }
   0xe   : > { %p2274_p11 = por %p171_p7, %p36_p0  ;;  %p2278_p12 = por %p177_p8, %p42_p3 }
   0xf   : > { %s1736_s11 = smul.u32 192, %s2176_s24  ;;  %p2289_p13 = pnand %p1751_p10, %p38_p5 }
  0x10   : > { %s2942_s8 = scalar_select %p2274_p11, 1, 0 }
  0x11   : > { %s2943_s9 = scalar_select %p2278_p12, 1, 0 }
  0x12   : > { %s1735_s12 = smul.u32 12, %s212_s10  ;;  %s2287_s15 = scalar_lea.hbm %s2926_s0, %s1736_s11 }
  0x13   : > { %s213_s19 = scalar_lea.sflag [#allocation4], %s212_s10  ;;  %s2080_s20 = scalar_lea.hbm %s2287_s15, 192 }
  0x14   : > { %s216_s17 = scalar_lea.vmem [#allocation3], %s1735_s12  ;;  %p2081_p2 = scmp.ne.s32.totalorder %s2287_s15, %s2080_s20 }
  0x15   : > { %s224_s18 = sshll.u32 %s216_s17, 4  ;;  %p2082_p3 = pneg %p2289_p13  ;;  %s2294_s18 = int_to_ptr.vmem [resolvable:$true] %s224_s18 }
  0x16   : > { %s2085_s29 = scalar_lea.hbm %s2926_s0, 384  ;;  %p2086_p7 = scmp.lt.u32.totalorder %s2287_s15, %s2926_s0 }
  0x17   : > { %p2083_p4 = pnand %p2082_p3, %p2081_p2  ;;  %p2087_p8 = scmp.lt.u32.totalorder %s2085_s29, %s2080_s20 }
  0x18   : > { %p2089_p9 = scmp.lt.u32.totalorder %s2080_s20, %s2287_s15 }
  0x19   : > { %p2084_p5 = pneg %p2083_p4  ;;  %p2088_p10 = por %p2087_p8, %p2086_p7 }
  0x1b   : > { %p2090_p0 = por %p2089_p9, %p2088_p10 }
  0x1d   : > { %p2091_p1 = pnand %p2090_p0, %p2084_p5 }
  0x1f   : > { %2094 = shalt.err (!%p2091_p1)
}
  0x20   : > { %s2095_s10 = scalar_lea.vmem %s2294_s18, 192  ;;  %s2178_s12 = smov [#allocation3]  }
  0x21   : > { %p2096_p2 = scmp.ne.s32.totalorder %s2294_s18, %s2095_s10  ;;  %s2100_s14 = sshll.u32 %s2178_s12, 4  ;;  %s2101_s14 = int_to_ptr.vmem [resolvable:$false] %s2100_s14 }
  0x22   : > { %s2102_s17 = scalar_lea.vmem %s2101_s14, 384  ;;  %p2103_p11 = scmp.lt.s32.totalorder %s2294_s18, %s2101_s14 }
  0x23   : > { %p2098_p4 = pnand %p2096_p2, %p2082_p3  ;;  %p2104_p7 = scmp.lt.s32.totalorder %s2102_s17, %s2095_s10 }
  0x25   : > { %p2099_p12 = pneg %p2098_p4  ;;  %p2105_p8 = por %p2104_p7, %p2103_p11 }
  0x27   : > { %p2106_p9 = pnand %p2105_p8, %p2099_p12 }
  0x29   : > { %2109 = shalt.err (!%p2106_p9)
}
  0x2a   : > { %1746 = dma.hbm_to_vmem [thread:$0]  (!%p2289_p13), %s2287_s15, 192, %s2294_s18, %s213_s19  }
  0x2b   : > { %p2945_p0 = scmp.lt.s32.totalorder %s2176_s24, 3  ;;  %p2946_p1 = scmp.ge.s32.totalorder %s2176_s24, 1 }
  0x2d   : > { %p230_p3 = pnand %p2946_p1, %p2945_p0 }
  0x2e   : > { %s2327_s20 = sand.u32 (!%p230_p3), 1, %s2168_s22  }
  0x2f   : > { %233 = sbr.rel (%p230_p3) target bundleno = 1012 (0x3f4), region = 44  ;;  %s236_s28 = scalar_lea.sflag (!%p230_p3), [#allocation4], %s2327_s20 }
  0x30   : > { %s2934_s26 = smul.u32 (!%p230_p3), 12, %s2327_s20 }
  0x32   : > { %s2333_s16 = scalar_lea.vmem (!%p230_p3), [#allocation3], %s2934_s26 }
  0x36   : > { %2155 = dma.done.wait (%p2267_p6), %s236_s28, 192  }
  0x37   : > { %2157 = vsyncadd (%p2267_p6), %s236_s28, 4294967104  ;;  %v2340_v0 = vld [vmem:[%s2333_s16] sm:$0xff]  ;;  %v2343_v1 = vld [vmem:[%s2333_s16 + $0x8] sm:$0xf]  ;;  %s2179_s15 = smov 126   ;;  %s2180_s7 = smov 110  }
  0x38   : > { %288 = vrot.lane.b32.xlu0 %v2340_v0, %s2179_s15  ;;  %v275_v2 = vcombine.low %v2343_v1, %v2343_v1  ;;  %v272_v3 = vcombine.high %v2340_v0, %v2340_v0  ;;  %s2181_s18 = smov 127   ;;  %v274_v5 = vcombine.low %v2340_v0, %v2340_v0  ;;  %s2182_s19 = smov 109   ;;  %v2186_v7 = vmov 0.0   ;;  %v386_v8 = vld [vmem:[%s2928_s2] sm:$0xff]  ;;  %v387_v10 = vld [vmem:[%s2928_s2 + $0x8] sm:$0xff]  ;;  %v388_v11 = vld [vmem:[%s2928_s2 + $0x10] sm:$0xff] }
  0x39   : > { %s2183_s29 = smov 108   ;;  %s2937_s11 = smov 92   ;;  %493 = vmatprep.mubr.f32.mxu1 %v2186_v7  ;;  %v2188_v9 = vmov 0   ;;  %v389_v12 = vld [vmem:[%s2928_s2 + $0x18] sm:$0xff]  ;;  %vm282_vm0 = vcmask 1039360   ;;  %vm369_vm1 = vcmask 1043456  }
  0x3a   : > { %v1808_v4 = vpack.i.bf16 %v275_v2, %v2340_v0  ;;  %v1803_v6 = vpack.i.bf16 %v2343_v1, %v272_v3  ;;  %s2935_s13 = smov 91   ;;  %s2939_s10 = smov 90   ;;  %1833 = vset.pattern.permute.xlu1 %v2188_v9  ;;  %1834 = vset.pattern.permute.xlu0 %v2188_v9  ;;  %vm306_vm2 = vcmask 900096   ;;  %vm294_vm3 = vcmask 1031168  }
  0x3b   : > { %vm318_vm4 = vcmask 891904   ;;  %vm330_vm5 = vcmask 883712   ;;  %vm342_vm6 = vcmask 752640   ;;  %vm354_vm7 = vcmask 744448   ;;  %s2950_s17 = smul.u32 12, %s2327_s20  ;;  %p2951_p11 = scmp.ne.s32.totalorder %s2942_s8, 0 }
  0x3c   : > { %1809 = vrot.lane.b32.xlu1 %v1808_v4, %s2180_s7  ;;  %1799 = vrot.lane.b32.xlu0 %v1808_v4, %s2181_s18  ;;  %vm366_vm8 = vcmask 736256   ;;  %vm410_vm9 = vcmask 293888   ;;  %vm644_vm10 = vcmask 154624   ;;  %vm649_vm11 = vcmask 868024   ;;  %s1738_s26 = smul.u32 192, %s2249_s25  ;;  %s2192_s25 = smov [#allocation6]  }
  0x3d   : > { %645 = vst.msk [vmem:[#allocation2] sm:$0xff] %vm644_vm10, %v2186_v7  ;;  %646 = vst.msk [vmem:[#allocation2 + $0x18] sm:$0xff] %vm644_vm10, %v2186_v7  ;;  %vm710_vm12 = vcmask 1047704   ;;  %vm713_vm13 = vcmask 711680   ;;  %vm2191_vm14 = vmmov 0   ;;  %vm1114_vm15 = vcmask 261120  }
  0x3e   : > { %647 = vst.msk [vmem:[#allocation2 + $0x30] sm:$0xff] %vm644_vm10, %v2186_v7  ;;  %648 = vst.msk [vmem:[#allocation2 + $0x48] sm:$0xff] %vm644_vm10, %v2186_v7  ;;  %s267_s28 = scalar_lea.vmem [#allocation6], %s2950_s17 }
  0x3f   : > { %651 = vst.msk [vmem:[#allocation2 + $0x28] sm:$0xff] %vm649_vm11, %v2186_v7  ;;  %650 = vst.msk [vmem:[#allocation2 + $0x10] sm:$0xff] %vm649_vm11, %v2186_v7 }
  0x40   : > { %276 = vrot.lane.b32.xlu1 %v274_v5, %s2181_s18  ;;  %1804 = vrot.lane.b32.xlu0 %v1803_v6, %s2179_s15  ;;  %652 = vst.msk [vmem:[#allocation2 + $0x40] sm:$0xff] %vm649_vm11, %v2186_v7  ;;  %653 = vst.msk [vmem:[#allocation2 + $0x58] sm:$0xff] %vm649_vm11, %v2186_v7 }
  0x44   : > { %300 = vrot.lane.b32.xlu1 %v274_v5, %s2180_s7  ;;  %1814 = vrot.lane.b32.xlu0 %v1803_v6, %s2182_s19 }
  0x48   : > { %1819 = vrot.lane.b32.xlu1 %v1808_v4, %s2183_s29  ;;  %1824 = vrot.lane.b32.xlu0 %v1803_v6, %s2937_s11 }
  0x4c   : > { %1829 = vrot.lane.b32.xlu1 %v1808_v4, %s2935_s13  ;;  %312 = vrot.lane.b32.xlu0 %v2340_v0, %s2182_s19 }
  0x50   : > { %324 = vrot.lane.b32.xlu1 %v274_v5, %s2183_s29  ;;  %336 = vrot.lane.b32.xlu0 %v2340_v0, %s2937_s11  ;;  %s1438_s11 = sshll.u32 %s267_s28, 4  ;;  %s2884_s11 = int_to_ptr.vmem [resolvable:$true] %s1438_s11 }
  0x54   : > { %348 = vrot.lane.b32.xlu1 %v274_v5, %s2935_s13  ;;  %362 = vrot.lane.b32.xlu0 %v272_v3, %s2939_s10  ;;  %s2189_s13 = smov 19  }
  0x58   : > { %364 = vrot.lane.b32.xlu1 %v2343_v1, %s2939_s10  ;;  %360 = vrot.lane.b32.xlu0 %v2340_v0, %s2939_s10  ;;  %s2110_s10 = scalar_lea.vmem %s2884_s11, 192 }
  0x59   : > { %p2111_p6 = scmp.ne.s32.totalorder %s2884_s11, %s2110_s10 }
  0x5b   : > { %p2112_p12 = pnand %p2111_p6, %p2951_p11 }
  0x5c   : > { %392 = vperm.xlu1 %1833, %v386_v8   ;;  %397 = vperm.xlu0 %1834, %v387_v10  }
  0x5d   : > { %p2113_p13 = pneg %p2112_p12 }
  0x60   : > { %402 = vperm.xlu1 %1833, %v388_v11   ;;  %v382_v11 = vld [vmem:[%s2927_s1] sm:$0xff] }
  0x64   : > { %407 = vperm.xlu1 %1833, %v389_v12  }
  0xaa   : > { %v289_v13 = vpop.permute.xlu0 %288 }
  0xae   : > { %v2388_v14 = vpop.permute.xlu1 %1809  ;;  %v2390_v15 = vpop.permute.xlu0 %1799 }
  0xaf   : > { %v1802_v16 = vunpack.i.h.bf16 %v2390_v15  ;;  %v1801_v17 = vunpack.i.l.bf16 %v2390_v15  ;;  %v1812_v18 = vunpack.i.h.bf16 %v2388_v14  ;;  %v1811_v19 = vunpack.i.l.bf16 %v2388_v14  ;;  %v383_v15 = vld [vmem:[%s2927_s1 + $0x8] sm:$0xff] }
  0xb1   : > { %v284_v20 = vsel %vm282_vm0, %v1801_v17, %v1802_v16  ;;  %v308_v28 = vsel %vm306_vm2, %v1811_v19, %v1812_v18  ;;  %v372_v9 = vsel %vm369_vm1, %v2343_v1, %v1802_v16  ;;  %v384_v16 = vld [vmem:[%s2927_s1 + $0x10] sm:$0xff] }
  0xb2   : > { %v277_v21 = vpop.permute.xlu1 %276  ;;  %v2399_v22 = vpop.permute.xlu0 %1804  ;;  %v371_v25 = vsel %vm369_vm1, %v272_v3, %v284_v20 }
  0xb3   : > { %v1807_v23 = vunpack.i.h.bf16 %v2399_v22  ;;  %v1806_v24 = vunpack.i.l.bf16 %v2399_v22  ;;  %v283_v26 = vsel %vm282_vm0, %v277_v21, %v1801_v17  ;;  %v615_v22 = vld [vmem:[%s2931_s5] sm:$0x7] }
  0xb4   : > { %v370_v35 = vsel %vm369_vm1, %v2340_v0, %v283_v26 }
  0xb5   : > { %v296_v27 = vsel %vm294_vm3, %v1806_v24, %v1807_v23  ;;  %v295_v34 = vsel %vm294_vm3, %v289_v13, %v1806_v24  ;;  %v375_v10 = vsel %vm369_vm1, %v1807_v23, %v1812_v18  ;;  %v385_v18 = vld [vmem:[%s2927_s1 + $0x18] sm:$0xff] }
  0xb6   : > { %v301_v29 = vpop.permute.xlu1 %300  ;;  %v1815_v30 = vpop.permute.xlu0 %1814  ;;  %v374_v31 = vsel %vm369_vm1, %v296_v27, %v308_v28  ;;  %v1613_v17 = vpack.c.bf16 %v375_v10, %v372_v9 }
  0xb7   : > { %v307_v32 = vsel %vm306_vm2, %v301_v29, %v1811_v19  ;;  %v1605_v33 = vpack.c.bf16 %v374_v31, %v371_v25  ;;  %v1817_v38 = vunpack.i.h.bf16 %v1815_v30  ;;  %v1816_v39 = vunpack.i.l.bf16 %v1815_v30 }
  0xb8   : > { %v373_v36 = vsel %vm369_vm1, %v295_v34, %v307_v32  ;;  %v617_v19 = vlaneseq }
  0xb9   : > { %1606 = vmatprep.subr.bf16.mxu1 %v1605_v33  ;;  %v1607_v37 = vpack.c.bf16 %v373_v36, %v370_v35  ;;  %v320_v46 = vsel %vm318_vm4, %v1816_v39, %v1817_v38 }
  0xba   : > { %v1820_v40 = vpop.permute.xlu1 %1819  ;;  %v1825_v41 = vpop.permute.xlu0 %1824  ;;  %v618_v20 = vshrl.u32 %v617_v19, 7 }
  0xbb   : > { %v1822_v42 = vunpack.i.h.bf16 %v1820_v40  ;;  %v1821_v43 = vunpack.i.l.bf16 %v1820_v40  ;;  %v1827_v44 = vunpack.i.h.bf16 %v1825_v41  ;;  %v1826_v45 = vunpack.i.l.bf16 %v1825_v41  ;;  %1608 = vmatpush1.bf16.msra.mxu1 %v1607_v37 }
  0xbc   : > { %v619_v21 = vsub.s32 0, %v618_v20  ;;  %v623_v23 = vsub.s32 1, %v618_v20 }
  0xbd   : > { %v332_v49 = vsel %vm330_vm5, %v1821_v43, %v1822_v42  ;;  %v344_v50 = vsel %vm342_vm6, %v1826_v45, %v1827_v44  ;;  %v378_v1 = vsel %vm369_vm1, %v1817_v38, %v1822_v42 }
  0xbe   : > { %v1830_v47 = vpop.permute.xlu1 %1829  ;;  %v313_v48 = vpop.permute.xlu0 %312  ;;  %v377_v56 = vsel %vm369_vm1, %v320_v46, %v332_v49  ;;  %v620_v27 = vrot.slane %v615_v22, %v619_v21  ;;  %v2476_v30 = vrot.slane %v615_v22, %v623_v23 }
  0xbf   : > { %v1832_v51 = vunpack.i.h.bf16 %v1830_v47  ;;  %v1831_v52 = vunpack.i.l.bf16 %v1830_v47  ;;  %v319_v62 = vsel %vm318_vm4, %v313_v48, %v1816_v39 }
  0xc1   : > { %v356_v53 = vsel %vm354_vm7, %v1831_v52, %v1832_v51  ;;  %v381_v12 = vsel %vm369_vm1, %v1827_v44, %v1832_v51 }
  0xc2   : > { %v325_v54 = vpop.permute.xlu1 %324  ;;  %v337_v55 = vpop.permute.xlu0 %336  ;;  %v380_v57 = vsel %vm369_vm1, %v344_v50, %v356_v53  ;;  %v1617_v14 = vpack.c.bf16 %v381_v12, %v378_v1 }
  0xc3   : > { %v1609_v58 = vpack.c.bf16 %v380_v57, %v377_v56  ;;  %v331_v59 = vsel %vm330_vm5, %v325_v54, %v1821_v43  ;;  %v343_v63 = vsel %vm342_vm6, %v337_v55, %v1826_v45  ;;  %v627_v56 = vsub.s32 2, %v618_v20 }
  0xc4   : > { %v376_v2 = vsel %vm369_vm1, %v319_v62, %v331_v59 }
  0xc5   : > { %1610 = vmatprep.subr.bf16.mxu1 %v1609_v58  ;;  %v628_v62 = vrot.slane %v615_v22, %v627_v56 }
  0xc6   : > { %v349_v60 = vpop.permute.xlu1 %348  ;;  %v363_v61 = vpop.permute.xlu0 %362 }
  0xc7   : > { %v355_v0 = vsel %vm354_vm7, %v349_v60, %v1831_v52 }
  0xc8   : > { %v379_v3 = vsel %vm369_vm1, %v343_v63, %v355_v0 }
  0xc9   : > { %v1611_v4 = vpack.c.bf16 %v379_v3, %v376_v2 }
  0xca   : > { %v365_v5 = vpop.permute.xlu1 %364  ;;  %v361_v6 = vpop.permute.xlu0 %360 }
  0xcb   : > { %1612 = vmatpush1.bf16.msra.mxu1 %v1611_v4  ;;  %v368_v8 = vsel %vm366_vm8, %v363_v61, %v365_v5  ;;  %v367_v13 = vsel %vm366_vm8, %v361_v6, %v363_v61 }
  0xcc   : > { %1513 = vmatprep.subr.msk.mxu1 %vm369_vm1, %v368_v8 }
  0xcf   : > { %1514 = vmatpush1.msk.msra.mxu1 %vm369_vm1, %v367_v13 }
  0xd0   : > { %1515 = vmatmul.mubr.msk.f32.vlgmr.msra.gmra.mrb[0].mxu1 %vm410_vm9, %v382_v11  ;;  %1614 = vmatprep.subr.bf16.mxu1 %v1613_v17 }
  0xd1   : > { %1616 = vmatpush3.bf16.msra.mxu1 %v1613_v17  ;;  %499 = vmatprep.mubr.f32.mxu1 %v2186_v7 }
  0xd2   : > { %1618 = vmatprep.subr.bf16.mxu1 %v1617_v14 }
  0xd4   : > { %1516 = vmatmul.mubr.msk.f32.gmra.mrb[2].mxu1 %vm410_vm9, %v383_v15 }
  0xd5   : > { %1620 = vmatpush3.bf16.msra.mxu1 %v1617_v14  ;;  %505 = vmatprep.mubr.f32.mxu1 %v2186_v7 }
  0xd6   : > { %1586 = vmatprep.subr.msk.mxu1 %vm369_vm1, %v365_v5 }
  0xd8   : > { %1517 = vmatmul.mubr.msk.f32.gmra.mrb[4].mxu1 %vm410_vm9, %v384_v16 }
  0xd9   : > { %1587 = vmatpush3.msk.msra.mxu1 %vm369_vm1, %v365_v5  ;;  %511 = vmatprep.mubr.f32.mxu1 %v2186_v7 }
  0xdb   : > { %v393_v24 = vpop.permute.xlu1 %392  ;;  %v398_v31 = vpop.permute.xlu0 %397 }
  0xdc   : > { %1518 = vmatmul.mubr.msk.f32.gmra.mrb[6].mxu1 %vm410_vm9, %v385_v18 }
  0xdd   : > { %1588 = vmatprep.mubr.msk.f32.mxu1 %vm410_vm9, %v382_v11 }
  0xdf   : > { %v403_v38 = vpop.permute.xlu1 %402 }
  0xe0   : > { %1589 = vmatmul.mubr.msk.f32.vlgmr.msra.gmra.mrb[8].mxu1 %vm410_vm9, %v383_v15 }
  0xe1   : > { %1591 = vmatprep.mubr.msk.f32.mxu1 %vm410_vm9, %v384_v16 }
  0xe3   : > { %v408_v50 = vpop.permute.xlu1 %407 }
  0xe4   : > { %1592 = vmatmul.mubr.msk.f32.gmra.mrb[10].mxu1 %vm410_vm9, %v385_v18 }
 0x1a3   : > { %v495_v25 = vpop.f32.mrb[0].mxu1 }
 0x1a4   : > { %v496_v26 = vadd.f32 %v495_v25, %v393_v24  ;;  %v497_v28 = vpop.f32.mrb[1].mxu1 }
 0x1a5   : > { %v498_v29 = vadd.f32 %v497_v28, %v393_v24 }
 0x1a6   : > { %v603_v32 = vmax.f32 %v496_v26, 0.0 }
 0x1a7   : > { %v604_v33 = vmax.f32 %v498_v29, 0.0  ;;  %v501_v34 = vpop.f32.mrb[2].mxu1 }
 0x1a8   : > { %v632_v35 = vmul.f32 %v620_v27, %v603_v32  ;;  %v502_v36 = vadd.f32 %v501_v34, %v398_v31  ;;  %v503_v37 = vpop.f32.mrb[3].mxu1 }
 0x1a9   : > { %v633_v39 = vmul.f32 %v2476_v30, %v604_v33  ;;  %v504_v40 = vadd.f32 %v503_v37, %v398_v31 }
 0x1aa   : > { %v606_v41 = vmax.f32 %v502_v36, 0.0  ;;  %666 = vrot.lane.b32.xlu0 %v632_v35, %s2189_s13 }
 0x1ab   : > { %v607_v42 = vmax.f32 %v504_v40, 0.0  ;;  %v507_v43 = vpop.f32.mrb[4].mxu1  ;;  %668 = vrot.lane.b32.xlu1 %v633_v39, %s2189_s13 }
 0x1ac   : > { %v635_v44 = vmul.f32 %v620_v27, %v606_v41  ;;  %v508_v45 = vadd.f32 %v507_v43, %v403_v38  ;;  %v509_v46 = vpop.f32.mrb[5].mxu1 }
 0x1ad   : > { %v636_v47 = vmul.f32 %v2476_v30, %v607_v42  ;;  %v510_v48 = vadd.f32 %v509_v46, %v403_v38 }
 0x1ae   : > { %v609_v49 = vmax.f32 %v508_v45, 0.0 }
 0x1af   : > { %v610_v51 = vmax.f32 %v510_v48, 0.0  ;;  %v513_v52 = vpop.f32.mrb[6].mxu1  ;;  %672 = vrot.lane.b32.xlu1 %v635_v44, %s2189_s13  ;;  %674 = vrot.lane.b32.xlu0 %v636_v47, %s2189_s13 }
 0x1b0   : > { %v638_v53 = vmul.f32 %v620_v27, %v609_v49  ;;  %v514_v54 = vadd.f32 %v513_v52, %v408_v50  ;;  %v515_v55 = vpop.f32.mrb[7].mxu1 }
 0x1b1   : > { %v639_v57 = vmul.f32 %v2476_v30, %v610_v51  ;;  %v516_v9 = vadd.f32 %v515_v55, %v408_v50 }
 0x1b2   : > { %v612_v58 = vmax.f32 %v514_v54, 0.0 }
 0x1b3   : > { %v1590_v59 = vpop.f32.mrb[8].mxu1  ;;  %680 = vrot.lane.b32.xlu1 %v639_v57, %s2189_s13  ;;  %678 = vrot.lane.b32.xlu0 %v638_v53, %s2189_s13  ;;  %v613_v1 = vmax.f32 %v516_v9, 0.0  ;;  %v2590_v57 = vld [vmem:[%s2929_s3] sm:$0xff] }
 0x1b4   : > { %v641_v60 = vmul.f32 %v620_v27, %v612_v58  ;;  %v590_v61 = vadd.f32 %v1590_v59, %v398_v31  ;;  %v584_v63 = vpop.f32.mrb[9].mxu1  ;;  %v1112_v58 = vcombine.high %v2590_v57, %v2590_v57  ;;  %v1104_v59 = vld [vmem:[%s2930_s4] sm:$0xf] }
 0x1b5   : > { %v585_v0 = vadd.f32 %v584_v63, %v393_v24  ;;  %v642_v15 = vmul.f32 %v2476_v30, %v613_v1 }
 0x1b6   : > { %v608_v2 = vmax.f32 %v590_v61, 0.0  ;;  %1323 = vmatprep.mubr.f32.mxu1 %v1112_v58  ;;  %1181 = vmatprep.mubr.f32.mxu0 %v1112_v58 }
 0x1b7   : > { %v605_v3 = vmax.f32 %v585_v0, 0.0  ;;  %v1593_v4 = vpop.f32.mrb[10].mxu1  ;;  %684 = vrot.lane.b32.xlu1 %v641_v60, %s2189_s13  ;;  %v1102_v60 = vld [vmem:[%s2333_s16] sm:$0xff] }
 0x1b8   : > { %v637_v5 = vmul.f32 %v628_v62, %v608_v2  ;;  %v600_v6 = vadd.f32 %v1593_v4, %v408_v50  ;;  %v594_v8 = vpop.f32.mrb[11].mxu1  ;;  %v1401_v61 = vcombine.high %v1102_v60, %v1102_v60 }
 0x1b9   : > { %v634_v10 = vmul.f32 %v628_v62, %v605_v3  ;;  %v595_v11 = vadd.f32 %v594_v8, %v403_v38 }
 0x1ba   : > { %v614_v12 = vmax.f32 %v600_v6, 0.0 }
 0x1bb   : > { %v611_v13 = vmax.f32 %v595_v11, 0.0  ;;  %676 = vrot.lane.b32.xlu1 %v637_v5, %s2189_s13  ;;  %670 = vrot.lane.b32.xlu0 %v634_v10, %s2189_s13 }
 0x1bc   : > { %v643_v17 = vmul.f32 %v628_v62, %v614_v12 }
 0x1bd   : > { %v640_v14 = vmul.f32 %v628_v62, %v611_v13  ;;  %v1103_v62 = vld [vmem:[%s2333_s16 + $0x8] sm:$0xf] }
 0x1bf   : > { %688 = vrot.lane.b32.xlu1 %v643_v17, %s2189_s13  ;;  %682 = vrot.lane.b32.xlu0 %v640_v14, %s2189_s13 }
 0x1c3   : > { %686 = vrot.lane.b32.xlu0 %v642_v15, %s2189_s13 }
 0x21c   : > { %v667_v16 = vpop.permute.xlu0 %666 }
 0x21d   : > { %711 = vst.msk [vmem:[#allocation2] sm:$0xff] %vm710_vm12, %v667_v16  ;;  %v669_v18 = vpop.permute.xlu1 %668 }
 0x21e   : > { %v690_v19 = vsel %vm644_vm10, %v667_v16, %v669_v18 }
 0x221   : > { %v673_v20 = vpop.permute.xlu1 %672  ;;  %v675_v21 = vpop.permute.xlu0 %674 }
 0x222   : > { %715 = vst.msk [vmem:[#allocation2 + $0x18] sm:$0xff] %vm710_vm12, %v673_v20  ;;  %v692_v22 = vsel %vm644_vm10, %v673_v20, %v675_v21 }
 0x223   : > { %v1621_v23 = vpack.c.bf16 %v692_v22, %v690_v19 }
 0x224   : > { %v724_v28 = vld [vmem:[#allocation2] sm:$0xff] }
 0x225   : > { %v681_v24 = vpop.permute.xlu1 %680  ;;  %v679_v25 = vpop.permute.xlu0 %678  ;;  %1622 = vmatprep.subr.bf16.mxu0 %v1621_v23 }
 0x226   : > { %v694_v26 = vsel %vm644_vm10, %v679_v25, %v681_v24  ;;  %718 = vst.msk [vmem:[#allocation2 + $0x30] sm:$0xff] %vm710_vm12, %v679_v25 }
 0x229   : > { %v685_v27 = vpop.permute.xlu1 %684  ;;  %v727_v29 = vld [vmem:[#allocation2 + $0x18] sm:$0xff] }
 0x22a   : > { %721 = vst.msk [vmem:[#allocation2 + $0x48] sm:$0xff] %vm710_vm12, %v685_v27  ;;  %v2505_v30 = vpack.i.bf16 %v727_v29, %v724_v28  ;;  %v1623_v31 = vpack.c.bf16 %v727_v29, %v724_v28 }
 0x22c   : > { %1836 = vrot.lane.b32.xlu0 %v2505_v30, %s2181_s18  ;;  %1624 = vmatpush1.bf16.msra.mxu0 %v1623_v31 }
 0x22d   : > { %v677_v32 = vpop.permute.xlu1 %676  ;;  %v671_v33 = vpop.permute.xlu0 %670  ;;  %v730_v37 = vld [vmem:[#allocation2 + $0x30] sm:$0xff] }
 0x22e   : > { %v693_v34 = vsel %vm644_vm10, %v675_v21, %v677_v32  ;;  %v691_v35 = vsel %vm644_vm10, %v669_v18, %v671_v33 }
 0x22f   : > { %717 = vst.msk [vmem:[#allocation2 + $0x28] sm:$0xff] %vm713_vm13, %v693_v34  ;;  %714 = vst.msk [vmem:[#allocation2 + $0x10] sm:$0xff] %vm713_vm13, %v691_v35 }
 0x230   : > { %1841 = vrot.lane.b32.xlu0 %v2505_v30, %s2179_s15 }
 0x231   : > { %v683_v36 = vpop.permute.xlu0 %682  ;;  %v733_v38 = vld [vmem:[#allocation2 + $0x48] sm:$0xff]  ;;  %v689_v41 = vpop.permute.xlu1 %688 }
 0x232   : > { %v695_v39 = vsel %vm644_vm10, %v681_v24, %v683_v36  ;;  %v2516_v40 = vpack.i.bf16 %v733_v38, %v730_v37  ;;  %v1627_v49 = vpack.c.bf16 %v733_v38, %v730_v37 }
 0x233   : > { %720 = vst.msk [vmem:[#allocation2 + $0x40] sm:$0xff] %vm713_vm13, %v695_v39 }
 0x234   : > { %1846 = vrot.lane.b32.xlu0 %v2505_v30, %s2180_s7  ;;  %1856 = vrot.lane.b32.xlu1 %v2516_v40, %s2181_s18 }
 0x235   : > { %v687_v42 = vpop.permute.xlu0 %686 }
 0x236   : > { %v696_v43 = vsel %vm644_vm10, %v685_v27, %v687_v42  ;;  %v697_v44 = vsel %vm644_vm10, %v687_v42, %v689_v41  ;;  %v2525_v45 = vld [vmem:[#allocation2 + $0x10] sm:$0xff]  ;;  %v2527_v46 = vld [vmem:[#allocation2 + $0x28] sm:$0xff] }
 0x237   : > { %723 = vst.msk [vmem:[#allocation2 + $0x58] sm:$0xff] %vm713_vm13, %v697_v44  ;;  %v1625_v47 = vpack.c.bf16 %v696_v43, %v694_v26  ;;  %v1695_v48 = vpack.c.bf16 %v2527_v46, %v2525_v45  ;;  %v1895_v50 = vpack.i.bf16 %v2525_v45, %v690_v19  ;;  %v1875_v54 = vpack.i.bf16 %v2527_v46, %v692_v22 }
 0x238   : > { %1851 = vrot.lane.b32.xlu0 %v2505_v30, %s2182_s19  ;;  %1861 = vrot.lane.b32.xlu1 %v2516_v40, %s2179_s15 }
 0x239   : > { %1626 = vmatprep.subr.bf16.mxu0 %v1625_v47 }
 0x23a   : > { %1628 = vmatpush1.bf16.msra.mxu0 %v1627_v49  ;;  %v2542_v52 = vld [vmem:[#allocation2 + $0x40] sm:$0xff] }
 0x23b   : > { %v1940_v56 = vpack.i.bf16 %v2542_v52, %v694_v26 }
 0x23c   : > { %1866 = vrot.lane.b32.xlu1 %v2516_v40, %s2180_s7  ;;  %1896 = vrot.lane.b32.xlu0 %v1895_v50, %s2181_s18 }
 0x23e   : > { %v2540_v51 = vld [vmem:[#allocation2 + $0x58] sm:$0xff] }
 0x23f   : > { %v1699_v53 = vpack.c.bf16 %v2540_v51, %v2542_v52  ;;  %v1920_v55 = vpack.i.bf16 %v2540_v51, %v696_v43 }
 0x240   : > { %1871 = vrot.lane.b32.xlu1 %v2516_v40, %s2182_s19  ;;  %1901 = vrot.lane.b32.xlu0 %v1895_v50, %s2179_s15 }
 0x244   : > { %1876 = vrot.lane.b32.xlu1 %v1875_v54, %s2181_s18  ;;  %1906 = vrot.lane.b32.xlu0 %v1895_v50, %s2180_s7 }
 0x248   : > { %1881 = vrot.lane.b32.xlu1 %v1875_v54, %s2179_s15  ;;  %1911 = vrot.lane.b32.xlu0 %v1895_v50, %s2182_s19 }
 0x24c   : > { %1886 = vrot.lane.b32.xlu1 %v1875_v54, %s2180_s7  ;;  %1916 = vrot.lane.b32.xlu0 %v1895_v50, %s2183_s29 }
 0x250   : > { %1891 = vrot.lane.b32.xlu1 %v1875_v54, %s2182_s19  ;;  %1921 = vrot.lane.b32.xlu0 %v1920_v55, %s2181_s18 }
 0x254   : > { %1941 = vrot.lane.b32.xlu1 %v1940_v56, %s2181_s18  ;;  %1926 = vrot.lane.b32.xlu0 %v1920_v55, %s2179_s15  ;;  %s2947_s18 = smov 92  }
 0x258   : > { %1946 = vrot.lane.b32.xlu1 %v1875_v54, %s2183_s29  ;;  %1931 = vrot.lane.b32.xlu0 %v1920_v55, %s2180_s7 }
 0x25c   : > { %1961 = vrot.lane.b32.xlu1 %v1940_v56, %s2179_s15  ;;  %1936 = vrot.lane.b32.xlu0 %v1920_v55, %s2182_s19  ;;  %s2948_s15 = smov 91  }
 0x260   : > { %1966 = vrot.lane.b32.xlu1 %v2516_v40, %s2183_s29  ;;  %1951 = vrot.lane.b32.xlu0 %v2505_v30, %s2183_s29 }
 0x264   : > { %1976 = vrot.lane.b32.xlu1 %v1940_v56, %s2180_s7  ;;  %1956 = vrot.lane.b32.xlu0 %v1920_v55, %s2183_s29  ;;  %s1424_s7 = scalar_lea.sflag [#allocation5], %s2327_s20 }
 0x268   : > { %1981 = vrot.lane.b32.xlu1 %v1875_v54, %s2947_s18  ;;  %1971 = vrot.lane.b32.xlu0 %v1895_v50, %s2947_s18 }
 0x26c   : > { %1996 = vrot.lane.b32.xlu1 %v1940_v56, %s2182_s19  ;;  %1986 = vrot.lane.b32.xlu0 %v2505_v30, %s2947_s18 }
 0x270   : > { %2001 = vrot.lane.b32.xlu1 %v2516_v40, %s2947_s18  ;;  %1991 = vrot.lane.b32.xlu0 %v1920_v55, %s2947_s18 }
 0x274   : > { %2011 = vrot.lane.b32.xlu1 %v1940_v56, %s2183_s29  ;;  %2006 = vrot.lane.b32.xlu0 %v1895_v50, %s2948_s15  ;;  %s2949_s29 = smov 90  }
 0x278   : > { %2016 = vrot.lane.b32.xlu1 %v1875_v54, %s2948_s15  ;;  %2021 = vrot.lane.b32.xlu0 %v2505_v30, %s2948_s15 }
 0x27c   : > { %2031 = vrot.lane.b32.xlu1 %v1940_v56, %s2947_s18  ;;  %2026 = vrot.lane.b32.xlu0 %v1920_v55, %s2948_s15 }
 0x280   : > { %2036 = vrot.lane.b32.xlu1 %v2516_v40, %s2948_s15  ;;  %2041 = vrot.lane.b32.xlu0 %v1895_v50, %s2949_s29 }
 0x284   : > { %2046 = vrot.lane.b32.xlu1 %v1940_v56, %s2948_s15  ;;  %2056 = vrot.lane.b32.xlu0 %v2505_v30, %s2949_s29  ;;  %s2882_s15 = scalar_lea.hbm %s2932_s6, %s1738_s26 }
 0x288   : > { %2051 = vrot.lane.b32.xlu1 %v1875_v54, %s2949_s29  ;;  %2061 = vrot.lane.b32.xlu0 %v1920_v55, %s2949_s29 }
 0x28c   : > { %2066 = vrot.lane.b32.xlu1 %v1940_v56, %s2949_s29  ;;  %1107 = vperm.xlu0 %1834, %v1104_v59  }
 0x290   : > { %2071 = vrot.lane.b32.xlu1 %v2516_v40, %s2949_s29  ;;  %1404 = vrot.lane.b32.xlu0 %v1401_v61, %s2182_s19  ;;  %s2114_s29 = sshll.u32 %s2192_s25, 4  ;;  %s2115_s29 = int_to_ptr.vmem [resolvable:$false] %s2114_s29 }
 0x291   : > { %s2116_s12 = scalar_lea.vmem %s2115_s29, 384  ;;  %p2117_p5 = scmp.lt.s32.totalorder %s2884_s11, %s2115_s29 }
 0x292   : > { %p2118_p10 = scmp.lt.s32.totalorder %s2116_s12, %s2110_s10 }
 0x294   : > { %1402 = vrot.lane.b32.xlu1 %v1102_v60, %s2182_s19  ;;  %p2119_p2 = por %p2118_p10, %p2117_p5 }
 0x296   : > { %p2120_p4 = pnand %p2119_p2, %p2113_p13 }
 0x298   : > { %1406 = vrot.lane.b32.xlu1 %v1103_v62, %s2182_s19 }
 0x29e   : > { %v1837_v63 = vpop.permute.xlu0 %1836 }
 0x29f   : > { %v1839_v1 = vunpack.i.h.bf16 %v1837_v63  ;;  %v1838_v14 = vunpack.i.l.bf16 %v1837_v63 }
 0x2a2   : > { %v2613_v0 = vpop.permute.xlu0 %1841 }
 0x2a3   : > { %v1844_v56 = vunpack.i.h.bf16 %v2613_v0  ;;  %v1843_v59 = vunpack.i.l.bf16 %v2613_v0 }
 0x2a6   : > { %v1857_v2 = vpop.permute.xlu1 %1856  ;;  %v2615_v3 = vpop.permute.xlu0 %1846 }
 0x2a7   : > { %v1859_v37 = vunpack.i.h.bf16 %v1857_v2  ;;  %v1858_v38 = vunpack.i.l.bf16 %v1857_v2 }
 0x2aa   : > { %v2617_v4 = vpop.permute.xlu1 %1861  ;;  %v2619_v5 = vpop.permute.xlu0 %1851 }
 0x2ab   : > { %v1863_v0 = vunpack.i.l.bf16 %v2617_v4 }
 0x2ae   : > { %v2621_v6 = vpop.permute.xlu1 %1866  ;;  %v2623_v8 = vpop.permute.xlu0 %1896 }
 0x2af   : > { %v1899_v11 = vunpack.i.h.bf16 %v2623_v8  ;;  %v1898_v12 = vunpack.i.l.bf16 %v2623_v8 }
 0x2b1   : > { %v773_v18 = vsel %vm282_vm0, %v1898_v12, %v1899_v11  ;;  %v772_v20 = vsel %vm282_vm0, %v1838_v14, %v1898_v12  ;;  %v1864_v14 = vunpack.i.h.bf16 %v2617_v4 }
 0x2b2   : > { %v2625_v9 = vpop.permute.xlu1 %1871  ;;  %v2627_v10 = vpop.permute.xlu0 %1901 }
 0x2b3   : > { %v1904_v41 = vunpack.i.h.bf16 %v2627_v10  ;;  %v1903_v42 = vunpack.i.l.bf16 %v2627_v10 }
 0x2b5   : > { %v817_v60 = vsel %vm294_vm3, %v1903_v42, %v1904_v41 }
 0x2b6   : > { %v2631_v13 = vpop.permute.xlu1 %1876  ;;  %v2633_v17 = vpop.permute.xlu0 %1906 }
 0x2b7   : > { %v1879_v15 = vunpack.i.h.bf16 %v2631_v13  ;;  %v1878_v16 = vunpack.i.l.bf16 %v2631_v13 }
 0x2b9   : > { %v775_v19 = vsel %vm282_vm0, %v1878_v16, %v1879_v15  ;;  %v774_v21 = vsel %vm282_vm0, %v1839_v1, %v1878_v16  ;;  %v1909_v16 = vunpack.i.h.bf16 %v2633_v17 }
 0x2ba   : > { %v2645_v22 = vpop.permute.xlu1 %1881  ;;  %v2647_v23 = vpop.permute.xlu0 %1911  ;;  %v1629_v24 = vpack.c.bf16 %v775_v19, %v773_v18  ;;  %v1631_v25 = vpack.c.bf16 %v774_v21, %v772_v20  ;;  %v816_v20 = vsel %vm294_vm3, %v1843_v59, %v1903_v42  ;;  %v1908_v21 = vunpack.i.l.bf16 %v2633_v17 }
 0x2bb   : > { %v1914_v30 = vunpack.i.h.bf16 %v2647_v23  ;;  %v1884_v32 = vunpack.i.h.bf16 %v2645_v22  ;;  %v1883_v33 = vunpack.i.l.bf16 %v2645_v22  ;;  %v1849_v42 = vunpack.i.h.bf16 %v2615_v3 }
 0x2bc   : > { %1630 = vmatprep.subr.bf16.mxu0 %v1629_v24 }
 0x2bd   : > { %1632 = vmatpush1.bf16.msra.mxu0 %v1631_v25  ;;  %v819_v47 = vsel %vm294_vm3, %v1883_v33, %v1884_v32  ;;  %v818_v2 = vsel %vm294_vm3, %v1844_v56, %v1883_v33 }
 0x2be   : > { %v2649_v26 = vpop.permute.xlu1 %1886  ;;  %v2651_v27 = vpop.permute.xlu0 %1916  ;;  %v1637_v63 = vpack.c.bf16 %v819_v47, %v817_v60  ;;  %v1639_v33 = vpack.c.bf16 %v818_v2, %v816_v20  ;;  %v1913_v2 = vunpack.i.l.bf16 %v2647_v23 }
 0x2bf   : > { %v1889_v61 = vunpack.i.h.bf16 %v2649_v26  ;;  %v1888_v62 = vunpack.i.l.bf16 %v2649_v26 }
 0x2c1   : > { %v863_v4 = vsel %vm306_vm2, %v1888_v62, %v1889_v61 }
 0x2c2   : > { %v2653_v28 = vpop.permute.xlu1 %1891  ;;  %v2655_v29 = vpop.permute.xlu0 %1921 }
 0x2c3   : > { %v1894_v31 = vunpack.i.h.bf16 %v2653_v28  ;;  %v1924_v35 = vunpack.i.h.bf16 %v2655_v29  ;;  %v1923_v36 = vunpack.i.l.bf16 %v2655_v29  ;;  %v1893_v56 = vunpack.i.l.bf16 %v2653_v28 }
 0x2c5   : > { %v1693_v34 = vpack.c.bf16 %v1894_v31, %v1914_v30  ;;  %v779_v50 = vsel %vm282_vm0, %v1923_v36, %v1924_v35  ;;  %v778_v55 = vsel %vm282_vm0, %v1859_v37, %v1923_v36 }
 0x2c6   : > { %v2667_v39 = vpop.permute.xlu1 %1941  ;;  %v2669_v40 = vpop.permute.xlu0 %1926 }
 0x2c7   : > { %v1944_v43 = vunpack.i.h.bf16 %v2667_v39  ;;  %v1943_v44 = vunpack.i.l.bf16 %v2667_v39  ;;  %1694 = vmatprep.subr.bf16.mxu1 %v1693_v34  ;;  %v1929_v12 = vunpack.i.h.bf16 %v2669_v40  ;;  %v1928_v1 = vunpack.i.l.bf16 %v2669_v40 }
 0x2c8   : > { %1696 = vmatpush3.bf16.msra.mxu1 %v1695_v48  ;;  %v1719_v40 = vpack.c.bf16 %v1889_v61, %v1909_v16 }
 0x2c9   : > { %v777_v49 = vsel %vm282_vm0, %v1943_v44, %v1944_v43  ;;  %v776_v54 = vsel %vm282_vm0, %v1858_v38, %v1943_v44  ;;  %v823_v36 = vsel %vm294_vm3, %v1928_v1, %v1929_v12  ;;  %v822_v38 = vsel %vm294_vm3, %v1864_v14, %v1928_v1 }
 0x2ca   : > { %v2690_v45 = vpop.permute.xlu1 %1946  ;;  %v2692_v46 = vpop.permute.xlu0 %1931  ;;  %v1633_v48 = vpack.c.bf16 %v779_v50, %v777_v49  ;;  %v1635_v58 = vpack.c.bf16 %v778_v55, %v776_v54  ;;  %v861_v54 = vsel %vm306_vm2, %v1908_v21, %v1909_v16  ;;  %v1848_v55 = vunpack.i.l.bf16 %v2615_v3 }
 0x2cb   : > { %v1934_v59 = vunpack.i.h.bf16 %v2692_v46  ;;  %v1933_v60 = vunpack.i.l.bf16 %v2692_v46  ;;  %vm1421_vm0 = vcmask 551936  }
 0x2cc   : > { %1634 = vmatprep.subr.bf16.mxu0 %v1633_v48  ;;  %v1645_v48 = vpack.c.bf16 %v863_v4, %v861_v54  ;;  %v860_v3 = vsel %vm306_vm2, %v1848_v55, %v1908_v21  ;;  %v907_v4 = vsel %vm318_vm4, %v1893_v56, %v1894_v31  ;;  %v905_v31 = vsel %vm318_vm4, %v1913_v2, %v1914_v30 }
 0x2cd   : > { %1636 = vmatpush1.bf16.msra.mxu0 %v1635_v58  ;;  %v862_v58 = vsel %vm306_vm2, %v1849_v42, %v1888_v62  ;;  %v1949_v55 = vunpack.i.h.bf16 %v2690_v45  ;;  %v1873_v30 = vunpack.i.l.bf16 %v2625_v9 }
 0x2ce   : > { %v2706_v18 = vpop.permute.xlu1 %1961  ;;  %v2708_v19 = vpop.permute.xlu0 %1936  ;;  %1638 = vmatprep.subr.bf16.mxu0 %v1637_v63  ;;  %v1869_v63 = vunpack.i.h.bf16 %v2621_v6 }
 0x2cf   : > { %v1964_v24 = vunpack.i.h.bf16 %v2706_v18  ;;  %v1963_v25 = vunpack.i.l.bf16 %v2706_v18 }
 0x2d1   : > { %1640 = vmatpush1.bf16.msra.mxu0 %v1639_v33  ;;  %v821_v34 = vsel %vm294_vm3, %v1963_v25, %v1964_v24  ;;  %v820_v37 = vsel %vm294_vm3, %v1863_v0, %v1963_v25  ;;  %v1868_v0 = vunpack.i.l.bf16 %v2621_v6  ;;  %v1647_v25 = vpack.c.bf16 %v862_v58, %v860_v3 }
 0x2d2   : > { %v2726_v44 = vpop.permute.xlu1 %1966  ;;  %v2728_v47 = vpop.permute.xlu0 %1951  ;;  %v1641_v49 = vpack.c.bf16 %v823_v36, %v821_v34  ;;  %v1643_v50 = vpack.c.bf16 %v822_v38, %v820_v37  ;;  %v1854_v33 = vunpack.i.h.bf16 %v2619_v5  ;;  %v867_v6 = vsel %vm306_vm2, %v1933_v60, %v1934_v59 }
 0x2d3   : > { %v866_v36 = vsel %vm306_vm2, %v1869_v63, %v1933_v60  ;;  %v1939_v58 = vunpack.i.h.bf16 %v2708_v19  ;;  %v1938_v60 = vunpack.i.l.bf16 %v2708_v19  ;;  %v1874_v63 = vunpack.i.h.bf16 %v2625_v9 }
 0x2d4   : > { %1642 = vmatprep.subr.bf16.mxu0 %v1641_v49  ;;  %v1853_v49 = vunpack.i.l.bf16 %v2619_v5  ;;  %v906_v54 = vsel %vm318_vm4, %v1854_v33, %v1893_v56  ;;  %v1919_v5 = vunpack.i.h.bf16 %v2651_v27  ;;  %v1918_v56 = vunpack.i.l.bf16 %v2651_v27 }
 0x2d5   : > { %1644 = vmatpush1.bf16.msra.mxu0 %v1643_v50  ;;  %v1653_v50 = vpack.c.bf16 %v907_v4, %v905_v31  ;;  %v1953_v19 = vunpack.i.l.bf16 %v2728_v47  ;;  %v911_v4 = vsel %vm318_vm4, %v1938_v60, %v1939_v58 }
 0x2d6   : > { %v2740_v1 = vpop.permute.xlu1 %1976  ;;  %v2742_v14 = vpop.permute.xlu0 %1956  ;;  %1646 = vmatprep.subr.bf16.mxu0 %v1645_v48  ;;  %v1948_v48 = vunpack.i.l.bf16 %v2690_v45  ;;  %v904_v23 = vsel %vm318_vm4, %v1853_v49, %v1913_v2  ;;  %v1701_v31 = vpack.c.bf16 %v1949_v55, %v1919_v5 }
 0x2d7   : > { %v1979_v62 = vunpack.i.h.bf16 %v2740_v1  ;;  %v1978_v20 = vunpack.i.l.bf16 %v2740_v1  ;;  %v1655_v45 = vpack.c.bf16 %v906_v54, %v904_v23  ;;  %v1958_v23 = vunpack.i.l.bf16 %v2742_v14 }
 0x2d8   : > { %v951_v2 = vsel %vm330_vm5, %v1948_v48, %v1949_v55 }
 0x2d9   : > { %1648 = vmatpush1.bf16.msra.mxu0 %v1647_v25  ;;  %v865_v34 = vsel %vm306_vm2, %v1978_v20, %v1979_v62  ;;  %v864_v21 = vsel %vm306_vm2, %v1868_v0, %v1978_v20  ;;  %v1954_v20 = vunpack.i.h.bf16 %v2728_v47  ;;  %v1723_v16 = vpack.c.bf16 %v1934_v59, %v1979_v62 }
 0x2da   : > { %v2760_v37 = vpop.permute.xlu1 %1981  ;;  %v2762_v38 = vpop.permute.xlu0 %1971  ;;  %v1649_v28 = vpack.c.bf16 %v867_v6, %v865_v34  ;;  %v1651_v42 = vpack.c.bf16 %v866_v36, %v864_v21  ;;  %v910_v6 = vsel %vm318_vm4, %v1874_v63, %v1938_v60  ;;  %v2190_v59 = vmov 0.0|0.0  }
 0x2db   : > { %v950_v54 = vsel %vm330_vm5, %v1954_v20, %v1948_v48  ;;  %v1974_v60 = vunpack.i.h.bf16 %v2762_v38  ;;  %v1973_v63 = vunpack.i.l.bf16 %v2762_v38  ;;  %v1984_v55 = vunpack.i.h.bf16 %v2760_v37 }
 0x2dc   : > { %1650 = vmatprep.subr.bf16.mxu0 %v1649_v28  ;;  %v1969_v48 = vunpack.i.h.bf16 %v2726_v44  ;;  %v1968_v38 = vunpack.i.l.bf16 %v2726_v44 }
 0x2dd   : > { %1652 = vmatpush1.bf16.msra.mxu0 %v1651_v42  ;;  %v949_v42 = vsel %vm330_vm5, %v1918_v56, %v1919_v5  ;;  %v993_v13 = vsel %vm342_vm6, %v1973_v63, %v1974_v60 }
 0x2de   : > { %v1997_v3 = vpop.permute.xlu1 %1996  ;;  %v2778_v0 = vpop.permute.xlu0 %1986  ;;  %1654 = vmatprep.subr.bf16.mxu0 %v1653_v50  ;;  %v1661_v49 = vpack.c.bf16 %v951_v2, %v949_v42  ;;  %v948_v50 = vsel %vm330_vm5, %v1953_v19, %v1918_v56  ;;  %v1709_v2 = vpack.c.bf16 %v1984_v55, %v1974_v60 }
 0x2df   : > { %v1999_v25 = vunpack.i.h.bf16 %v1997_v3  ;;  %v1998_v33 = vunpack.i.l.bf16 %v1997_v3  ;;  %v1663_v51 = vpack.c.bf16 %v950_v54, %v948_v50  ;;  %v1989_v52 = vunpack.i.h.bf16 %v2778_v0 }
 0x2e1   : > { %v1697_v9 = vpack.c.bf16 %v1939_v58, %v1999_v25  ;;  %1656 = vmatpush1.bf16.msra.mxu0 %v1655_v45  ;;  %v909_v34 = vsel %vm318_vm4, %v1998_v33, %v1999_v25  ;;  %v908_v27 = vsel %vm318_vm4, %v1873_v30, %v1998_v33  ;;  %v1959_v58 = vunpack.i.h.bf16 %v2742_v14 }
 0x2e2   : > { %v2787_v21 = vpop.permute.xlu1 %2001  ;;  %v2789_v36 = vpop.permute.xlu0 %1991  ;;  %v1657_v28 = vpack.c.bf16 %v911_v4, %v909_v34  ;;  %v1659_v47 = vpack.c.bf16 %v910_v6, %v908_v27  ;;  %v1983_v30 = vunpack.i.l.bf16 %v2760_v37  ;;  %v1703_v14 = vpack.c.bf16 %v1879_v15, %v1899_v11 }
 0x2e3   : > { %1698 = vmatprep.subr.bf16.mxu1 %v1697_v9  ;;  %v955_v8 = vsel %vm330_vm5, %v1958_v23, %v1959_v58  ;;  %v954_v11 = vsel %vm330_vm5, %v1969_v48, %v1958_v23  ;;  %v2004_v27 = vunpack.i.h.bf16 %v2787_v21  ;;  %v1994_v6 = vunpack.i.h.bf16 %v2789_v36 }
 0x2e4   : > { %1658 = vmatprep.subr.bf16.mxu0 %v1657_v28  ;;  %1700 = vmatpush3.bf16.msra.mxu1 %v1699_v53  ;;  %v1988_v53 = vunpack.i.l.bf16 %v2778_v0  ;;  %v995_v20 = vsel %vm342_vm6, %v1983_v30, %v1984_v55  ;;  %v1707_v0 = vpack.c.bf16 %v1924_v35, %v1944_v43  ;;  %v994_v34 = vsel %vm342_vm6, %v1989_v52, %v1983_v30 }
 0x2e5   : > { %1660 = vmatpush1.bf16.msra.mxu0 %v1659_v47  ;;  %1702 = vmatprep.subr.bf16.mxu1 %v1701_v31  ;;  %v1993_v28 = vunpack.i.l.bf16 %v2789_v36  ;;  %v1669_v29 = vpack.c.bf16 %v995_v20, %v993_v13  ;;  %v1711_v43 = vpack.c.bf16 %v1884_v32, %v1904_v41  ;;  %v2003_v47 = vunpack.i.l.bf16 %v2787_v21 }
 0x2e6   : > { %v2012_v5 = vpop.permute.xlu1 %2011  ;;  %v2809_v56 = vpop.permute.xlu0 %2006  ;;  %1662 = vmatprep.subr.bf16.mxu0 %v1661_v49  ;;  %v992_v9 = vsel %vm342_vm6, %v1988_v53, %v1973_v63  ;;  %v1715_v55 = vpack.c.bf16 %v1929_v12, %v1964_v24 }
 0x2e7   : > { %v2014_v37 = vunpack.i.h.bf16 %v2012_v5  ;;  %v2013_v3 = vunpack.i.l.bf16 %v2012_v5  ;;  %v2009_v42 = vunpack.i.h.bf16 %v2809_v56  ;;  %v1671_v36 = vpack.c.bf16 %v994_v34, %v992_v9 }
 0x2e8   : > { %1704 = vmatpush3.bf16.msra.mxu1 %v1703_v14  ;;  %v2008_v50 = vunpack.i.l.bf16 %v2809_v56  ;;  %v999_v10 = vsel %vm342_vm6, %v1993_v28, %v1994_v6  ;;  %v998_v22 = vsel %vm342_vm6, %v2004_v27, %v1993_v28 }
 0x2e9   : > { %v1705_v15 = vpack.c.bf16 %v1959_v58, %v2014_v37  ;;  %1664 = vmatpush1.bf16.msra.mxu0 %v1663_v51  ;;  %v953_v44 = vsel %vm330_vm5, %v2013_v3, %v2014_v37  ;;  %v952_v45 = vsel %vm330_vm5, %v1968_v38, %v2013_v3 }
 0x2ea   : > { %v2017_v19 = vpop.permute.xlu1 %2016  ;;  %v2022_v25 = vpop.permute.xlu0 %2021  ;;  %v1665_v33 = vpack.c.bf16 %v955_v8, %v953_v44  ;;  %v1667_v4 = vpack.c.bf16 %v954_v11, %v952_v45  ;;  %v1037_v56 = vsel %vm354_vm7, %v2008_v50, %v2009_v42 }
 0x2eb   : > { %1706 = vmatprep.subr.bf16.mxu1 %v1705_v15  ;;  %v2019_v35 = vunpack.i.h.bf16 %v2017_v19  ;;  %v2018_v39 = vunpack.i.l.bf16 %v2017_v19  ;;  %v2023_v54 = vunpack.i.l.bf16 %v2022_v25  ;;  %v2024_v60 = vunpack.i.h.bf16 %v2022_v25 }
 0x2ec   : > { %1666 = vmatprep.subr.bf16.mxu0 %v1665_v33  ;;  %1708 = vmatpush3.bf16.msra.mxu1 %v1707_v0 }
 0x2ed   : > { %1668 = vmatpush1.bf16.msra.mxu0 %v1667_v4  ;;  %1710 = vmatprep.subr.bf16.mxu1 %v1709_v2  ;;  %v1039_v63 = vsel %vm354_vm7, %v2018_v39, %v2019_v35  ;;  %v1717_v5 = vpack.c.bf16 %v2019_v35, %v2009_v42  ;;  %v1036_v51 = vsel %vm354_vm7, %v2023_v54, %v2008_v50 }
 0x2ee   : > { %v2032_v31 = vpop.permute.xlu1 %2031  ;;  %v2027_v49 = vpop.permute.xlu0 %2026  ;;  %1670 = vmatprep.subr.bf16.mxu0 %v1669_v29  ;;  %v1677_v37 = vpack.c.bf16 %v1039_v63, %v1037_v56  ;;  %v1038_v18 = vsel %vm354_vm7, %v2024_v60, %v2018_v39 }
 0x2ef   : > { %v2034_v58 = vunpack.i.h.bf16 %v2032_v31  ;;  %v2033_v23 = vunpack.i.l.bf16 %v2032_v31  ;;  %v2029_v52 = vunpack.i.h.bf16 %v2027_v49  ;;  %v2028_v53 = vunpack.i.l.bf16 %v2027_v49 }
 0x2f0   : > { %1712 = vmatpush3.bf16.msra.mxu1 %v1711_v43  ;;  %v1679_v15 = vpack.c.bf16 %v1038_v18, %v1036_v51 }
 0x2f1   : > { %v1713_v32 = vpack.c.bf16 %v1994_v6, %v2034_v58  ;;  %1672 = vmatpush1.bf16.msra.mxu0 %v1671_v36  ;;  %v997_v41 = vsel %vm342_vm6, %v2033_v23, %v2034_v58  ;;  %v996_v21 = vsel %vm342_vm6, %v2003_v47, %v2033_v23  ;;  %v1043_v0 = vsel %vm354_vm7, %v2028_v53, %v2029_v52 }
 0x2f2   : > { %v2037_v30 = vpop.permute.xlu1 %2036  ;;  %v2042_v14 = vpop.permute.xlu0 %2041  ;;  %v1673_v48 = vpack.c.bf16 %v999_v10, %v997_v41  ;;  %v1675_v38 = vpack.c.bf16 %v998_v22, %v996_v21 }
 0x2f3   : > { %1714 = vmatprep.subr.bf16.mxu1 %v1713_v32  ;;  %v2039_v3 = vunpack.i.h.bf16 %v2037_v30  ;;  %v2038_v8 = vunpack.i.l.bf16 %v2037_v30  ;;  %v2044_v44 = vunpack.i.h.bf16 %v2042_v14  ;;  %v2043_v45 = vunpack.i.l.bf16 %v2042_v14 }
 0x2f4   : > { %1674 = vmatprep.subr.bf16.mxu0 %v1673_v48  ;;  %1716 = vmatpush3.bf16.msra.mxu1 %v1715_v55 }
 0x2f5   : > { %1676 = vmatpush1.bf16.msra.mxu0 %v1675_v38  ;;  %1718 = vmatprep.subr.bf16.mxu1 %v1717_v5  ;;  %v1042_v61 = vsel %vm354_vm7, %v2039_v3, %v2028_v53  ;;  %v1081_v29 = vsel %vm366_vm8, %v2043_v45, %v2044_v44 }
 0x2f6   : > { %v2047_v12 = vpop.permute.xlu1 %2046  ;;  %v2057_v24 = vpop.permute.xlu0 %2056  ;;  %1678 = vmatprep.subr.bf16.mxu0 %v1677_v37 }
 0x2f7   : > { %v2049_v11 = vunpack.i.h.bf16 %v2047_v12  ;;  %v2048_v13 = vunpack.i.l.bf16 %v2047_v12  ;;  %v2058_v20 = vunpack.i.l.bf16 %v2057_v24  ;;  %v2059_v9 = vunpack.i.h.bf16 %v2057_v24 }
 0x2f8   : > { %1720 = vmatpush3.bf16.msra.mxu1 %v1719_v40 }
 0x2f9   : > { %v1721_v19 = vpack.c.bf16 %v2029_v52, %v2049_v11  ;;  %1680 = vmatpush1.bf16.msra.mxu0 %v1679_v15  ;;  %v1041_v17 = vsel %vm354_vm7, %v2048_v13, %v2049_v11  ;;  %v1040_v26 = vsel %vm354_vm7, %v2038_v8, %v2048_v13  ;;  %v1080_v6 = vsel %vm366_vm8, %v2058_v20, %v2043_v45 }
 0x2fa   : > { %v2052_v25 = vpop.permute.xlu1 %2051  ;;  %v2062_v33 = vpop.permute.xlu0 %2061  ;;  %v1681_v4 = vpack.c.bf16 %v1043_v0, %v1041_v17  ;;  %v1683_v2 = vpack.c.bf16 %v1042_v61, %v1040_v26 }
 0x2fb   : > { %v2054_v34 = vunpack.i.h.bf16 %v2052_v25  ;;  %v2053_v27 = vunpack.i.l.bf16 %v2052_v25  ;;  %1722 = vmatprep.subr.bf16.mxu1 %v1721_v19  ;;  %v2064_v28 = vunpack.i.h.bf16 %v2062_v33  ;;  %v2063_v46 = vunpack.i.l.bf16 %v2062_v33 }
 0x2fc   : > { %1682 = vmatprep.subr.bf16.mxu0 %v1681_v4  ;;  %1724 = vmatpush3.bf16.msra.mxu1 %v1723_v16 }
 0x2fd   : > { %v1082_v1 = vsel %vm366_vm8, %v2059_v9, %v2053_v27  ;;  %v1726_v35 = vpack.c.bf16 %v2054_v34, %v2044_v44  ;;  %1684 = vmatpush1.bf16.msra.mxu0 %v1683_v2  ;;  %1725 = vmatprep.subr.bf16.mxu1 %v2190_v59  ;;  %v1083_v62 = vsel %vm366_vm8, %v2053_v27, %v2054_v34 }
 0x2fe   : > { %v1687_v39 = vpack.c.bf16 %v1082_v1, %v1080_v6  ;;  %v2067_v43 = vpop.permute.xlu1 %2066  ;;  %v1685_v47 = vpack.c.bf16 %v1083_v62, %v1081_v29  ;;  %v1087_v50 = vsel %vm366_vm8, %v2063_v46, %v2064_v28 }
 0x2ff   : > { %v2069_v42 = vunpack.i.h.bf16 %v2067_v43  ;;  %v2068_v31 = vunpack.i.l.bf16 %v2067_v43  ;;  %1324 = vmatmul.mubr.f32.vlgmr.msra.gmra.mrb[12].mxu1 %v2590_v57 }
 0x300   : > { %1686 = vmatprep.subr.bf16.mxu0 %v1685_v47  ;;  %1727 = vmatpush3.bf16.msra.mxu1 %v1726_v35 }
 0x301   : > { %v1729_v49 = vpack.c.bf16 %v2064_v28, %v2069_v42  ;;  %1182 = vmatmul.mubr.f32.vlgmr.msra.gmra.mrb[0].mxu0 %v2590_v57  ;;  %1728 = vmatprep.subr.bf16.mxu1 %v2190_v59  ;;  %v1085_v36 = vsel %vm366_vm8, %v2068_v31, %v2069_v42  ;;  %v1101_v57 = vld [vmem:[%s2929_s3 + $0x8] sm:$0xf] }
 0x302   : > { %1688 = vmatpush1.bf16.msra.mxu0 %v1687_v39  ;;  %v2072_v54 = vpop.permute.xlu1 %2071  ;;  %v1689_v58 = vpack.c.bf16 %v1087_v50, %v1085_v36  ;;  %1602 = vmatprep.mubr.msk.f32.mxu1 %vm2191_vm14, %v2186_v7 }
 0x303   : > { %v2074_v23 = vunpack.i.h.bf16 %v2072_v54  ;;  %v2073_v60 = vunpack.i.l.bf16 %v2072_v54  ;;  %1252 = vmatprep.mubr.f32.mxu0 %v2186_v7 }
 0x304   : > { %1690 = vmatprep.subr.bf16.mxu0 %v1689_v58  ;;  %1730 = vmatpush3.bf16.msra.mxu1 %v1729_v49 }
 0x305   : > { %v1084_v10 = vsel %vm366_vm8, %v2073_v60, %v2068_v31  ;;  %v1086_v22 = vsel %vm366_vm8, %v2074_v23, %v2063_v46 }
 0x306   : > { %v1691_v32 = vpack.c.bf16 %v1086_v22, %v1084_v10  ;;  %v1403_v7 = vpop.permute.xlu1 %1402 }
 0x307   : > { %1603 = vmatmul.mubr.msk.f32.vlgmr.msra.gmra.mrb[14].mxu1 %vm1114_vm15, %v1101_v57 }
 0x308   : > { %1692 = vmatpush1.bf16.msra.mxu0 %v1691_v32 }
 0x30a   : > { %v1407_v48 = vpop.permute.xlu1 %1406 }
 0x30b   : > { %1524 = vmatmul.mubr.msk.f32.vlgmr.msra.gmra.mrb[0].mxu0 %vm1114_vm15, %v1101_v57  ;;  %v1108_v55 = vpop.permute.xlu0 %1107 }
 0x30f   : > { %v1405_v51 = vpop.permute.xlu0 %1404 }
 0x310   : > { %v1409_v53 = vsel %vm318_vm4, %v1405_v51, %v1407_v48  ;;  %v1408_v3 = vsel %vm318_vm4, %v1403_v7, %v1405_v51 }
 0x3d2   : > { %v1570_v41 = vpop.f32.mrb[12].mxu1 }
 0x3d3   : > { %v1571_v21 = vpop.f32.mrb[13].mxu1 }
 0x3d4   : > { %v1572_v63 = vadd.f32 %v1571_v21, %v1570_v41 }
 0x3d6   : > { %v1326_v30 = vadd.f32 %v1572_v63, %v1108_v55 }
 0x3da   : > { %v1395_v14 = vpop.f32.mrb[14].mxu1 }
 0x3db   : > { %v1396_v38 = vadd.f32 %v1395_v14, %v1326_v30  ;;  %v1604_v5 = vpop.f32.mrb[15].mxu1 }
 0x3dd   : > { %v1415_v56 = vadd.f32 %v1407_v48, %v1396_v38 }
 0x3de   : > { %v1254_v52 = vpop.f32.mrb[0].mxu0 }
 0x3df   : > { %v1731_v37 = vadd.f32 %v1254_v52, %v1108_v55  ;;  %v1256_v18 = vpop.f32.mrb[1].mxu0  ;;  %1422 = vst.msk [vmem:[%s267_s28 + $0x8] sm:$0xf] %vm1421_vm0, %v1415_v56 }
 0x3e0   : > { %v1732_v40 = vadd.f32 %v1256_v18, %v1108_v55 }
 0x3e1   : > { %v1413_v12 = vadd.f32 %v1731_v37, %v1408_v3 }
 0x3e2   : > { %v1414_v24 = vadd.f32 %v1732_v40, %v1409_v53 }
 0x3e4   : > { %v1418_v8 = vcombine.low %v1413_v12, %v1414_v24 }
 0x3e6   : > { %1420 = vst [vmem:[%s267_s28] sm:$0xff] %v1418_v8 }
 0x3e7   : > { %2123 = shalt.err (!%p2120_p4)
}
 0x3e8   : > { %s2124_s20 = scalar_lea.hbm %s2882_s15, 192  ;;  %s2128_s19 = scalar_lea.hbm %s2932_s6, 384 }
 0x3e9   : > { %p2125_p7 = scmp.ne.s32.totalorder %s2882_s15, %s2124_s20  ;;  %p2129_p0 = scmp.lt.u32.totalorder %s2882_s15, %s2932_s6 }
 0x3ea   : > { %p2130_p1 = scmp.lt.u32.totalorder %s2128_s19, %s2124_s20  ;;  %p2132_p6 = scmp.lt.u32.totalorder %s2124_s20, %s2882_s15 }
 0x3eb   : > { %p2126_p8 = pnand %p2125_p7, %p2951_p11 }
 0x3ec   : > { %p2131_p3 = por %p2130_p1, %p2129_p0 }
 0x3ed   : > { %p2127_p9 = pneg %p2126_p8 }
 0x3ee   : > { %p2133_p12 = por %p2132_p6, %p2131_p3 }
 0x3f0   : > { %p2134_p13 = pnand %p2133_p12, %p2127_p9 }
 0x3f2   : > { %2137 = shalt.err (!%p2134_p13)
}
 0x3f3   : > { %1741 = dma.vmem_to_hbm [thread:$0]  (%p2951_p11), %s2884_s11, 192, %s2882_s15, %s1424_s7  }
 0x3f4 PF: > { %s1450_s26 = sand.u32 1, %s2164_s21   ;;  %p2952_p5 = scmp.ne.s32.totalorder %s2943_s9, 0 }
 0x3f5   : > { %p2953_p10 = scmp.ge.s32.totalorder %s2176_s24, 2  ;;  %s1451_s13 = scalar_lea.sflag [#allocation5], %s1450_s26 }
 0x3f7   : > { %p1748_p2 = pnand %p2953_p10, %p2952_p5 }
 0x3f9   : > { %2159 = dma.done.wait (!%p1748_p2), %s1451_s13, 192  }
 0x3fa   : > { %2161 = vsyncadd (!%p1748_p2), %s1451_s13, 4294967104  ;;  %p19_p4 = scmp.ge.s32.totalorder %s2253_s27, 4   ;;  %s2954_s21 = smov %s2168_s22 }
 0x3fb   : > { %s2955_s22 = smov %s2172_s23  ;;  %s2956_s23 = smov %s2265_s30 }
 0x3fc   : > { %s2957_s24 = smov %s2253_s27  ;;  %21 = sbr.rel (!%p19_p4) target bundleno = 5 (0x5), region = 89 }
 0x403   :  { %1456 = vsyncpa [#allocation4], 1 }
 0x404   :  { %1458 = vsyncpa [#allocation4 + $0x1], 1 }
 0x405   :  { %1459 = vsyncpa [#allocation5], 1 }
 0x406   :  { %1461 = vsyncpa [#allocation5 + $0x1], 1 }

</bundles_post_ra>
